<compile_context>
chip_gen: v7x
topology: tpu7x:2x2x1
jax: 0.10.0
libtpu: 0.0.40
codegen_flags: <defaults>
</compile_context>

<pallas_src>
import functools

import jax
import jax.numpy as jnp
from jax import lax
from jax.experimental import pallas as pl
from jax.experimental.pallas import tpu as pltpu


# ----------------------------------------------------------------------------
# helpers
# ----------------------------------------------------------------------------
def _round_up(v, m):
    return (v + m - 1) // m * m


def _bf16(a):
    return a.astype(jnp.bfloat16)


# ----------------------------------------------------------------------------
# Pallas kernel: fused transposed GEMM + bias + activation
#   O[N, tn] = act(W[N, K] @ X[K, tn] + b[N, 1])
# ----------------------------------------------------------------------------
def _gemm_bias_act_kernel(w_ref, x_ref, b_ref, o_ref, *, act):
    y = jnp.dot(w_ref[...], x_ref[...], preferred_element_type=jnp.float32)
    y = y + b_ref[...]                      # (N,1) broadcast across lanes, f32
    if act == "relu":
        y = jnp.maximum(y, 0.0)
    elif act == "sigmoid":
        y = jax.nn.sigmoid(y)
    o_ref[...] = y.astype(o_ref.dtype)


def gemm_bias_act(w, x, b, act="none", out_dtype=jnp.float32, tn_max=512):
    """act(w @ x + b); w:(N,K) bf16, x:(K,M) bf16, b:(N,1) f32.

    Gridded over M (the lane dimension) in tiles of `tn` lanes so the kernel
    pipelines HBM<->VMEM, never scales its VMEM footprint with batch size,
    and the grid can shard across TensorCores ("parallel").
    """
    N, K = w.shape
    K2, M = x.shape
    assert K == K2, (K, K2)

    Mp = _round_up(M, 128)                 # lane-align
    tn = min(tn_max, Mp)
    Mp = _round_up(Mp, tn)
    if Mp != M:
        x = jnp.pad(x, ((0, 0), (0, Mp - M)))

    out = pl.pallas_call(
        functools.partial(_gemm_bias_act_kernel, act=act),
        out_shape=jax.ShapeDtypeStruct((N, Mp), out_dtype),
        grid_spec=pltpu.PrefetchScalarGridSpec(
            num_scalar_prefetch=0,
            grid=(Mp // tn,),
            in_specs=[
                pl.BlockSpec((N, K), lambda i: (0, 0)),    # weights, resident
                pl.BlockSpec((K, tn), lambda i: (0, i)),   # activation patches
                pl.BlockSpec((N, 1), lambda i: (0, 0)),    # bias, resident
            ],
            out_specs=pl.BlockSpec((N, tn), lambda i: (0, i)),
        ),
        compiler_params=pltpu.CompilerParams(
            dimension_semantics=("parallel",)),
    )(w, x, b)
    return out if Mp == M else out[:, :M]


# ----------------------------------------------------------------------------
# Conv2d(k=4, s=2, p=1) — activations kept channel-major: (C, B, H, W)
# ----------------------------------------------------------------------------
def conv2d_k4s2p1(a, layer, act, out_dtype=jnp.bfloat16):
    Cin, B, H, W = a.shape
    Ho, Wo = H // 2, W // 2
    ap = jnp.pad(_bf16(a), ((0, 0), (0, 0), (1, 1), (1, 1)))
    taps = [ap[:, :, ky:ky + 2 * Ho:2, kx:kx + 2 * Wo:2]
            for ky in range(4) for kx in range(4)]
    xT = jnp.stack(taps, axis=0).reshape(16 * Cin, B * Ho * Wo)   # (K, M)
    o = gemm_bias_act(layer["W"], xT, layer["b"], act=act, out_dtype=out_dtype)
    return o.reshape(-1, B, Ho, Wo)


# ----------------------------------------------------------------------------
# ConvTranspose2d(k=4, s=2, p=1) — sub-pixel decomposition, no zero insertion.
# Each output phase (r,s) in {0,1}^2 is a 2x2-tap conv on the padded input;
# all 4 phases are packed into one GEMM with N = 4*Cout and interleaved after.
# ----------------------------------------------------------------------------
def conv_transpose2d_k4s2p1(a, layer, act, out_dtype=jnp.bfloat16):
    Cin, B, H, W = a.shape
    ap = jnp.pad(_bf16(a), ((0, 0), (0, 0), (1, 1), (1, 1)))
    taps = [ap[:, :, dy:dy + H, dx:dx + W]
            for dy in range(3) for dx in range(3)]
    xT = jnp.stack(taps, axis=0).reshape(9 * Cin, B * H * W)      # (K, M)
    o = gemm_bias_act(layer["W"], xT, layer["b"], act=act, out_dtype=out_dtype)
    Cout = o.shape[0] // 4
    o = o.reshape(2, 2, Cout, B, H, W)                    # (r, s, co, b, m, n)
    o = jnp.transpose(o, (2, 3, 4, 0, 5, 1)).reshape(Cout, B, 2 * H, 2 * W)
    return o


# ----------------------------------------------------------------------------
# Weight folding (done once at init): fold PyTorch layouts, im2col ordering,
# Linear transposes and ConvT phase decomposition into the stored weights.
# ----------------------------------------------------------------------------
def _fold_conv(w, b):                     # torch Conv2d weight: (Cout, Cin, 4, 4)
    Cout, Cin = w.shape[0], w.shape[1]
    W = jnp.transpose(w, (0, 2, 3, 1)).reshape(Cout, 16 * Cin)   # cols: (ky,kx,ci)
    return {"W": _bf16(W), "b": jnp.asarray(b, jnp.float32).reshape(Cout, 1)}


# (output phase r, padded-input tap offset d) -> transpose-conv kernel index ky
_CT_TAP = {(0, 0): 3, (0, 1): 1, (1, 1): 2, (1, 2): 0}


def _fold_convT(w, b):                    # torch ConvTranspose2d: (Cin, Cout, 4, 4)
    Cin, Cout = w.shape[0], w.shape[1]
    Wp = jnp.zeros((2, 2, Cout, 3, 3, Cin), jnp.float32)
    for (r, dy), ky in _CT_TAP.items():
        for (s, dx), kx in _CT_TAP.items():
            Wp = Wp.at[r, s, :, dy, dx, :].set(jnp.transpose(w[:, :, ky, kx]))
    Wp = Wp.reshape(4 * Cout, 9 * Cin)    # rows: (r,s,co); cols: (dy,dx,ci)
    bp = jnp.tile(jnp.asarray(b, jnp.float32), 4).reshape(4 * Cout, 1)
    return {"W": _bf16(Wp), "b": bp}


def _fold_linear(w, b):                   # torch Linear weight: (out, in)
    return {"W": _bf16(jnp.asarray(w)),
            "b": jnp.asarray(b, jnp.float32).reshape(-1, 1)}


def fold_params(raw):
    return {
        "e1": _fold_conv(raw["e1_w"], raw["e1_b"]),
        "e2": _fold_conv(raw["e2_w"], raw["e2_b"]),
        "e3": _fold_conv(raw["e3_w"], raw["e3_b"]),
        # fc_mu and fc_logvar fused into one lane-denser GEMM (N = 2*dim_z)
        "heads": {
            "W": _bf16(jnp.concatenate([raw["mu_w"], raw["lv_w"]], axis=0)),
            "b": jnp.concatenate([raw["mu_b"], raw["lv_b"]],
                                 axis=0).astype(jnp.float32).reshape(-1, 1),
        },
        "cls1": _fold_linear(raw["c1_w"], raw["c1_b"]),
        "cls2": _fold_linear(raw["c2_w"], raw["c2_b"]),
        "dfc": _fold_linear(raw["dfc_w"], raw["dfc_b"]),
        "d3": _fold_convT(raw["d3_w"], raw["d3_b"]),
        "d2": _fold_convT(raw["d2_w"], raw["d2_b"]),
        "d1": _fold_convT(raw["d1_w"], raw["d1_b"]),
    }


# ----------------------------------------------------------------------------
# Full VAE forward (all static sizes derived from weight shapes, never from
# traced values — fixes the previous `reshape(B, 4*c, 4, 4)` tracer error).
# ----------------------------------------------------------------------------
def vae_forward(fp, x_nchw):
    B = x_nchw.shape[0]
    a = jnp.transpose(x_nchw, (1, 0, 2, 3))                    # (1, B, 32, 32)

    # ---- Encoder ----
    a = conv2d_k4s2p1(a, fp["e1"], act="relu")                 # (c,  B, 16, 16)
    a = conv2d_k4s2p1(a, fp["e2"], act="relu")                 # (2c, B,  8,  8)
    a = conv2d_k4s2p1(a, fp["e3"], act="relu")                 # (4c, B,  4,  4)

    C4, _, Hb, Wb = a.shape
    # PyTorch .view(B, -1) flattens (C,H,W) per sample -> transposed (feat, B)
    h_t = jnp.transpose(a, (0, 2, 3, 1)).reshape(C4 * Hb * Wb, B)
    heads = gemm_bias_act(fp["heads"]["W"], h_t, fp["heads"]["b"])  # (2*dz, B)
    dz = heads.shape[0] // 2
    mu_t, logvar_t = heads[:dz], heads[dz:]

    # ---- Classifier (on latent_mu) ----
    clsh = gemm_bias_act(fp["cls1"]["W"], _bf16(mu_t), fp["cls1"]["b"],
                         act="relu")                           # (128, B)
    cls_t = gemm_bias_act(fp["cls2"]["W"], _bf16(clsh), fp["cls2"]["b"])

    # ---- latent_sample (eval mode: latent = mu) ----
    # TODO(synk): training-mode reparameterization (eps ~ N(0,1)) omitted;
    # eval-mode path (latent = mu) is reproduced exactly.
    latent_t = mu_t

    # ---- Decoder ----
    d_t = gemm_bias_act(fp["dfc"]["W"], _bf16(latent_t), fp["dfc"]["b"],
                        out_dtype=jnp.bfloat16)                # (feat, B)
    c4 = d_t.shape[0] // 16
    d = jnp.transpose(d_t.reshape(c4, 4, 4, B), (0, 3, 1, 2))  # (4c, B, 4, 4)
    d = conv_transpose2d_k4s2p1(d, fp["d3"], act="relu")       # (2c, B,  8,  8)
    d = conv_transpose2d_k4s2p1(d, fp["d2"], act="relu")       # (c,  B, 16, 16)
    d = conv_transpose2d_k4s2p1(d, fp["d1"], act="sigmoid",
                                out_dtype=jnp.float32)         # (1,  B, 32, 32)
    x_recon = jnp.transpose(d, (1, 0, 2, 3))                   # (B, 1, 32, 32)

    return x_recon, mu_t.T, logvar_t.T, cls_t.T


# ----------------------------------------------------------------------------
# Plain-XLA fp32 reference (mirrors the PyTorch module) for a sanity check.
# ----------------------------------------------------------------------------
def _ref_conv(x, w, b):
    y = lax.conv_general_dilated(x, w, (2, 2), ((1, 1), (1, 1)),
                                 dimension_numbers=("NCHW", "OIHW", "NCHW"))
    return y + b[None, :, None, None]


def _ref_convT(x, w, b):
    wf = jnp.transpose(w[:, :, ::-1, ::-1], (1, 0, 2, 3))      # (Cout, Cin, 4, 4)
    y = lax.conv_general_dilated(x, wf, (1, 1), ((2, 2), (2, 2)),
                                 lhs_dilation=(2, 2),
                                 dimension_numbers=("NCHW", "OIHW", "NCHW"))
    return y + b[None, :, None, None]


def ref_forward(raw, x):
    h = jax.nn.relu(_ref_conv(x, raw["e1_w"], raw["e1_b"]))
    h = jax.nn.relu(_ref_conv(h, raw["e2_w"], raw["e2_b"]))
    h = jax.nn.relu(_ref_conv(h, raw["e3_w"], raw["e3_b"]))
    hf = h.reshape(h.shape[0], -1)
    mu = hf @ raw["mu_w"].T + raw["mu_b"]
    lv = hf @ raw["lv_w"].T + raw["lv_b"]
    ch = jax.nn.relu(mu @ raw["c1_w"].T + raw["c1_b"])
    cls = ch @ raw["c2_w"].T + raw["c2_b"]
    d = mu @ raw["dfc_w"].T + raw["dfc_b"]
    d = d.reshape(d.shape[0], -1, 4, 4)
    d = jax.nn.relu(_ref_convT(d, raw["d3_w"], raw["d3_b"]))
    d = jax.nn.relu(_ref_convT(d, raw["d2_w"], raw["d2_b"]))
    xr = jax.nn.sigmoid(_ref_convT(d, raw["d1_w"], raw["d1_b"]))
    return xr, mu, lv, cls


# ----------------------------------------------------------------------------
# Deterministic parameter construction (PyTorch layouts), then fold.
# ----------------------------------------------------------------------------
def init_raw_params(key, c, dim_z, ncls):
    ks = jax.random.split(key, 22)
    n = lambda k, shp, s=0.05: (s * jax.random.normal(k, shp)).astype(jnp.float32)
    feat = 4 * c * 4 * 4
    return {
        "e1_w": n(ks[0], (c, 1, 4, 4)),           "e1_b": n(ks[1], (c,)),
        "e2_w": n(ks[2], (2 * c, c, 4, 4)),       "e2_b": n(ks[3], (2 * c,)),
        "e3_w": n(ks[4], (4 * c, 2 * c, 4, 4)),   "e3_b": n(ks[5], (4 * c,)),
        "mu_w": n(ks[6], (dim_z, feat)),          "mu_b": n(ks[7], (dim_z,)),
        "lv_w": n(ks[8], (dim_z, feat)),          "lv_b": n(ks[9], (dim_z,)),
        "c1_w": n(ks[10], (128, dim_z)),          "c1_b": n(ks[11], (128,)),
        "c2_w": n(ks[12], (ncls, 128)),           "c2_b": n(ks[13], (ncls,)),
        "dfc_w": n(ks[14], (feat, dim_z)),        "dfc_b": n(ks[15], (feat,)),
        "d3_w": n(ks[16], (4 * c, 2 * c, 4, 4)),  "d3_b": n(ks[17], (2 * c,)),
        "d2_w": n(ks[18], (2 * c, c, 4, 4)),      "d2_b": n(ks[19], (c,)),
        "d1_w": n(ks[20], (c, 1, 4, 4)),          "d1_b": n(ks[21], (1,)),
    }


if __name__ == "__main__":
    key = jax.random.PRNGKey(0)
    c, dim_z, ncls = 4, 8, 5
    B, H, W = 2, 32, 32     # three stride-2 convs -> 4x4 bottleneck

    k_x, k_p = jax.random.split(key)
    x = jax.random.normal(k_x, (B, 1, H, W), dtype=jnp.float32)   # NCHW
    raw = init_raw_params(k_p, c, dim_z, ncls)
    params = fold_params(raw)

    fwd = jax.jit(vae_forward)
    x_recon, mu, logvar, cls = fwd(params, x)
    jax.block_until_ready((x_recon, mu, logvar, cls))

    assert x_recon.shape == (B, 1, H, W)
    assert mu.shape == (B, dim_z)
    assert logvar.shape == (B, dim_z)
    assert cls.shape == (B, ncls)

    # Numerical sanity check vs the plain-XLA fp32 reference (loose tolerance
    # because GEMM operands are bf16 with f32 accumulation).
    r_recon, r_mu, r_lv, r_cls = ref_forward(raw, x)
    for got, want in ((x_recon, r_recon), (mu, r_mu),
                      (logvar, r_lv), (cls, r_cls)):
        err = float(jnp.max(jnp.abs(got.astype(jnp.float32) - want)))
        assert err < 2e-2, err

    print("KERNEL_OK")
</pallas_src>

<mosaic_0001>
module attributes {stable_mosaic.version = 11 : i64} {
  func.func @_gemm_bias_act_kernel(%arg0: i32, %arg1: memref<4x16xbf16, #tpu.memory_space<vmem>>, %arg2: memref<16x512xbf16, #tpu.memory_space<vmem>>, %arg3: memref<4x1xf32, #tpu.memory_space<vmem>>, %arg4: memref<4x512xbf16, #tpu.memory_space<vmem>>) attributes {dimension_semantics = [#tpu.dimension_semantics<parallel>], iteration_bounds = array<i64: 1>, scalar_prefetch = 0 : i64, scratch_operands = 0 : i64, tpu.core_type = #tpu.core_type<tc>, window_params = [{pipeline_mode = #tpu.pipeline_mode<synchronous>, transform_indices = @transform_0, window_bounds = array<i64: 4, 16>}, {transform_indices = @transform_1, window_bounds = array<i64: 16, 512>}, {pipeline_mode = #tpu.pipeline_mode<synchronous>, transform_indices = @transform_2, window_bounds = array<i64: 4, 1>}, {transform_indices = @transform_3, window_bounds = array<i64: 4, 512>}]} {
    %c0 = arith.constant 0 : index
    %c0_0 = arith.constant 0 : index
    %0 = vector.load %arg1[%c0, %c0_0] : memref<4x16xbf16, #tpu.memory_space<vmem>>, vector<4x16xbf16>
    %c0_1 = arith.constant 0 : index
    %c0_2 = arith.constant 0 : index
    %1 = vector.load %arg2[%c0_1, %c0_2] : memref<16x512xbf16, #tpu.memory_space<vmem>>, vector<16x512xbf16>
    %cst = arith.constant dense<0.000000e+00> : vector<4x512xf32>
    %2 = tpu.matmul %0, %1, %cst {dimension_numbers = #tpu.dot_dimension_numbers<[1], [0], [0], [1], [0, 0, 1, 1], [], []>} : vector<4x16xbf16>, vector<16x512xbf16>, vector<4x512xf32> -> vector<4x512xf32>
    %c0_3 = arith.constant 0 : index
    %c0_4 = arith.constant 0 : index
    %3 = vector.load %arg3[%c0_3, %c0_4] : memref<4x1xf32, #tpu.memory_space<vmem>>, vector<4x1xf32>
    %4 = vector.broadcast %3 : vector<4x1xf32> to vector<4x512xf32>
    %5 = arith.addf %2, %4 : vector<4x512xf32>
    %cst_5 = arith.constant 0.000000e+00 : f32
    %6 = vector.broadcast %cst_5 : f32 to vector<4x512xf32>
    %7 = arith.maximumf %5, %6 : vector<4x512xf32>
    %8 = arith.truncf %7 : vector<4x512xf32> to vector<4x512xbf16>
    %c0_6 = arith.constant 0 : index
    %c0_7 = arith.constant 0 : index
    %9 = vector.load %arg4[%c0_6, %c0_7] : memref<4x512xbf16, #tpu.memory_space<vmem>>, vector<4x512xbf16>
    tpu.vector_store %arg4[%c0_6, %c0_7], %8 {strides = array<i32>} : memref<4x512xbf16, #tpu.memory_space<vmem>>, vector<4x512xbf16>,
    return
  }
  func.func @transform_0(%arg0: i32) -> (i32, i32) {
    %c0_i32 = arith.constant 0 : i32
    %c0_i32_0 = arith.constant 0 : i32
    %c0_i32_1 = arith.constant 0 : i32
    return %c0_i32, %c0_i32_0 : i32, i32
  }
  func.func @transform_1(%arg0: i32) -> (i32, i32) {
    %c0_i32 = arith.constant 0 : i32
    %c0_i32_0 = arith.constant 0 : i32
    return %c0_i32, %arg0 : i32, i32
  }
  func.func @transform_2(%arg0: i32) -> (i32, i32) {
    %c0_i32 = arith.constant 0 : i32
    %c0_i32_0 = arith.constant 0 : i32
    %c0_i32_1 = arith.constant 0 : i32
    return %c0_i32, %c0_i32_0 : i32, i32
  }
  func.func @transform_3(%arg0: i32) -> (i32, i32) {
    %c0_i32 = arith.constant 0 : i32
    %c0_i32_0 = arith.constant 0 : i32
    return %c0_i32, %arg0 : i32, i32
  }
}

module attributes {stable_mosaic.version = 11 : i64} {
  func.func @_gemm_bias_act_kernel(%arg0: i32, %arg1: memref<8x64xbf16, #tpu.memory_space<vmem>>, %arg2: memref<64x128xbf16, #tpu.memory_space<vmem>>, %arg3: memref<8x1xf32, #tpu.memory_space<vmem>>, %arg4: memref<8x128xbf16, #tpu.memory_space<vmem>>) attributes {dimension_semantics = [#tpu.dimension_semantics<parallel>], iteration_bounds = array<i64: 1>, scalar_prefetch = 0 : i64, scratch_operands = 0 : i64, tpu.core_type = #tpu.core_type<tc>, window_params = [{pipeline_mode = #tpu.pipeline_mode<synchronous>, transform_indices = @transform_0, window_bounds = array<i64: 8, 64>}, {transform_indices = @transform_1, window_bounds = array<i64: 64, 128>}, {pipeline_mode = #tpu.pipeline_mode<synchronous>, transform_indices = @transform_2, window_bounds = array<i64: 8, 1>}, {transform_indices = @transform_3, window_bounds = array<i64: 8, 128>}]} {
    %c0 = arith.constant 0 : index
    %c0_0 = arith.constant 0 : index
    %0 = vector.load %arg1[%c0, %c0_0] : memref<8x64xbf16, #tpu.memory_space<vmem>>, vector<8x64xbf16>
    %c0_1 = arith.constant 0 : index
    %c0_2 = arith.constant 0 : index
    %1 = vector.load %arg2[%c0_1, %c0_2] : memref<64x128xbf16, #tpu.memory_space<vmem>>, vector<64x128xbf16>
    %cst = arith.constant dense<0.000000e+00> : vector<8x128xf32>
    %2 = tpu.matmul %0, %1, %cst {dimension_numbers = #tpu.dot_dimension_numbers<[1], [0], [0], [1], [0, 0, 1, 1], [], []>} : vector<8x64xbf16>, vector<64x128xbf16>, vector<8x128xf32> -> vector<8x128xf32>
    %c0_3 = arith.constant 0 : index
    %c0_4 = arith.constant 0 : index
    %3 = vector.load %arg3[%c0_3, %c0_4] : memref<8x1xf32, #tpu.memory_space<vmem>>, vector<8x1xf32>
    %4 = vector.broadcast %3 : vector<8x1xf32> to vector<8x128xf32>
    %5 = arith.addf %2, %4 : vector<8x128xf32>
    %cst_5 = arith.constant 0.000000e+00 : f32
    %6 = vector.broadcast %cst_5 : f32 to vector<8x128xf32>
    %7 = arith.maximumf %5, %6 : vector<8x128xf32>
    %8 = arith.truncf %7 : vector<8x128xf32> to vector<8x128xbf16>
    %c0_6 = arith.constant 0 : index
    %c0_7 = arith.constant 0 : index
    %9 = vector.load %arg4[%c0_6, %c0_7] : memref<8x128xbf16, #tpu.memory_space<vmem>>, vector<8x128xbf16>
    tpu.vector_store %arg4[%c0_6, %c0_7], %8 {strides = array<i32>} : memref<8x128xbf16, #tpu.memory_space<vmem>>, vector<8x128xbf16>,
    return
  }
  func.func @transform_0(%arg0: i32) -> (i32, i32) {
    %c0_i32 = arith.constant 0 : i32
    %c0_i32_0 = arith.constant 0 : i32
    %c0_i32_1 = arith.constant 0 : i32
    return %c0_i32, %c0_i32_0 : i32, i32
  }
  func.func @transform_1(%arg0: i32) -> (i32, i32) {
    %c0_i32 = arith.constant 0 : i32
    %c0_i32_0 = arith.constant 0 : i32
    return %c0_i32, %arg0 : i32, i32
  }
  func.func @transform_2(%arg0: i32) -> (i32, i32) {
    %c0_i32 = arith.constant 0 : i32
    %c0_i32_0 = arith.constant 0 : i32
    %c0_i32_1 = arith.constant 0 : i32
    return %c0_i32, %c0_i32_0 : i32, i32
  }
  func.func @transform_3(%arg0: i32) -> (i32, i32) {
    %c0_i32 = arith.constant 0 : i32
    %c0_i32_0 = arith.constant 0 : i32
    return %c0_i32, %arg0 : i32, i32
  }
}

module attributes {stable_mosaic.version = 11 : i64} {
  func.func @_gemm_bias_act_kernel(%arg0: i32, %arg1: memref<16x128xbf16, #tpu.memory_space<vmem>>, %arg2: memref<128x128xbf16, #tpu.memory_space<vmem>>, %arg3: memref<16x1xf32, #tpu.memory_space<vmem>>, %arg4: memref<16x128xbf16, #tpu.memory_space<vmem>>) attributes {dimension_semantics = [#tpu.dimension_semantics<parallel>], iteration_bounds = array<i64: 1>, scalar_prefetch = 0 : i64, scratch_operands = 0 : i64, tpu.core_type = #tpu.core_type<tc>, window_params = [{pipeline_mode = #tpu.pipeline_mode<synchronous>, transform_indices = @transform_0, window_bounds = array<i64: 16, 128>}, {transform_indices = @transform_1, window_bounds = array<i64: 128, 128>}, {pipeline_mode = #tpu.pipeline_mode<synchronous>, transform_indices = @transform_2, window_bounds = array<i64: 16, 1>}, {transform_indices = @transform_3, window_bounds = array<i64: 16, 128>}]} {
    %c0 = arith.constant 0 : index
    %c0_0 = arith.constant 0 : index
    %0 = vector.load %arg1[%c0, %c0_0] : memref<16x128xbf16, #tpu.memory_space<vmem>>, vector<16x128xbf16>
    %c0_1 = arith.constant 0 : index
    %c0_2 = arith.constant 0 : index
    %1 = vector.load %arg2[%c0_1, %c0_2] : memref<128x128xbf16, #tpu.memory_space<vmem>>, vector<128x128xbf16>
    %cst = arith.constant dense<0.000000e+00> : vector<16x128xf32>
    %2 = tpu.matmul %0, %1, %cst {dimension_numbers = #tpu.dot_dimension_numbers<[1], [0], [0], [1], [0, 0, 1, 1], [], []>} : vector<16x128xbf16>, vector<128x128xbf16>, vector<16x128xf32> -> vector<16x128xf32>
    %c0_3 = arith.constant 0 : index
    %c0_4 = arith.constant 0 : index
    %3 = vector.load %arg3[%c0_3, %c0_4] : memref<16x1xf32, #tpu.memory_space<vmem>>, vector<16x1xf32>
    %4 = vector.broadcast %3 : vector<16x1xf32> to vector<16x128xf32>
    %5 = arith.addf %2, %4 : vector<16x128xf32>
    %cst_5 = arith.constant 0.000000e+00 : f32
    %6 = vector.broadcast %cst_5 : f32 to vector<16x128xf32>
    %7 = arith.maximumf %5, %6 : vector<16x128xf32>
    %8 = arith.truncf %7 : vector<16x128xf32> to vector<16x128xbf16>
    %c0_6 = arith.constant 0 : index
    %c0_7 = arith.constant 0 : index
    %9 = vector.load %arg4[%c0_6, %c0_7] : memref<16x128xbf16, #tpu.memory_space<vmem>>, vector<16x128xbf16>
    tpu.vector_store %arg4[%c0_6, %c0_7], %8 {strides = array<i32>} : memref<16x128xbf16, #tpu.memory_space<vmem>>, vector<16x128xbf16>,
    return
  }
  func.func @transform_0(%arg0: i32) -> (i32, i32) {
    %c0_i32 = arith.constant 0 : i32
    %c0_i32_0 = arith.constant 0 : i32
    %c0_i32_1 = arith.constant 0 : i32
    return %c0_i32, %c0_i32_0 : i32, i32
  }
  func.func @transform_1(%arg0: i32) -> (i32, i32) {
    %c0_i32 = arith.constant 0 : i32
    %c0_i32_0 = arith.constant 0 : i32
    return %c0_i32, %arg0 : i32, i32
  }
  func.func @transform_2(%arg0: i32) -> (i32, i32) {
    %c0_i32 = arith.constant 0 : i32
    %c0_i32_0 = arith.constant 0 : i32
    %c0_i32_1 = arith.constant 0 : i32
    return %c0_i32, %c0_i32_0 : i32, i32
  }
  func.func @transform_3(%arg0: i32) -> (i32, i32) {
    %c0_i32 = arith.constant 0 : i32
    %c0_i32_0 = arith.constant 0 : i32
    return %c0_i32, %arg0 : i32, i32
  }
}

module attributes {stable_mosaic.version = 11 : i64} {
  func.func @_gemm_bias_act_kernel(%arg0: i32, %arg1: memref<128x8xbf16, #tpu.memory_space<vmem>>, %arg2: memref<8x128xbf16, #tpu.memory_space<vmem>>, %arg3: memref<128x1xf32, #tpu.memory_space<vmem>>, %arg4: memref<128x128xf32, #tpu.memory_space<vmem>>) attributes {dimension_semantics = [#tpu.dimension_semantics<parallel>], iteration_bounds = array<i64: 1>, scalar_prefetch = 0 : i64, scratch_operands = 0 : i64, tpu.core_type = #tpu.core_type<tc>, window_params = [{pipeline_mode = #tpu.pipeline_mode<synchronous>, transform_indices = @transform_0, window_bounds = array<i64: 128, 8>}, {transform_indices = @transform_1, window_bounds = array<i64: 8, 128>}, {pipeline_mode = #tpu.pipeline_mode<synchronous>, transform_indices = @transform_2, window_bounds = array<i64: 128, 1>}, {transform_indices = @transform_3, window_bounds = array<i64: 128, 128>}]} {
    %c0 = arith.constant 0 : index
    %c0_0 = arith.constant 0 : index
    %0 = vector.load %arg1[%c0, %c0_0] : memref<128x8xbf16, #tpu.memory_space<vmem>>, vector<128x8xbf16>
    %c0_1 = arith.constant 0 : index
    %c0_2 = arith.constant 0 : index
    %1 = vector.load %arg2[%c0_1, %c0_2] : memref<8x128xbf16, #tpu.memory_space<vmem>>, vector<8x128xbf16>
    %cst = arith.constant dense<0.000000e+00> : vector<128x128xf32>
    %2 = tpu.matmul %0, %1, %cst {dimension_numbers = #tpu.dot_dimension_numbers<[1], [0], [0], [1], [0, 0, 1, 1], [], []>} : vector<128x8xbf16>, vector<8x128xbf16>, vector<128x128xf32> -> vector<128x128xf32>
    %c0_3 = arith.constant 0 : index
    %c0_4 = arith.constant 0 : index
    %3 = vector.load %arg3[%c0_3, %c0_4] : memref<128x1xf32, #tpu.memory_space<vmem>>, vector<128x1xf32>
    %4 = vector.broadcast %3 : vector<128x1xf32> to vector<128x128xf32>
    %5 = arith.addf %2, %4 : vector<128x128xf32>
    %cst_5 = arith.constant 0.000000e+00 : f32
    %6 = vector.broadcast %cst_5 : f32 to vector<128x128xf32>
    %7 = arith.maximumf %5, %6 : vector<128x128xf32>
    %c0_6 = arith.constant 0 : index
    %c0_7 = arith.constant 0 : index
    %8 = vector.load %arg4[%c0_6, %c0_7] : memref<128x128xf32, #tpu.memory_space<vmem>>, vector<128x128xf32>
    tpu.vector_store %arg4[%c0_6, %c0_7], %7 {strides = array<i32>} : memref<128x128xf32, #tpu.memory_space<vmem>>, vector<128x128xf32>,
    return
  }
  func.func @transform_0(%arg0: i32) -> (i32, i32) {
    %c0_i32 = arith.constant 0 : i32
    %c0_i32_0 = arith.constant 0 : i32
    %c0_i32_1 = arith.constant 0 : i32
    return %c0_i32, %c0_i32_0 : i32, i32
  }
  func.func @transform_1(%arg0: i32) -> (i32, i32) {
    %c0_i32 = arith.constant 0 : i32
    %c0_i32_0 = arith.constant 0 : i32
    return %c0_i32, %arg0 : i32, i32
  }
  func.func @transform_2(%arg0: i32) -> (i32, i32) {
    %c0_i32 = arith.constant 0 : i32
    %c0_i32_0 = arith.constant 0 : i32
    %c0_i32_1 = arith.constant 0 : i32
    return %c0_i32, %c0_i32_0 : i32, i32
  }
  func.func @transform_3(%arg0: i32) -> (i32, i32) {
    %c0_i32 = arith.constant 0 : i32
    %c0_i32_0 = arith.constant 0 : i32
    return %c0_i32, %arg0 : i32, i32
  }
}

module attributes {stable_mosaic.version = 11 : i64} {
  func.func @_gemm_bias_act_kernel(%arg0: i32, %arg1: memref<16x256xbf16, #tpu.memory_space<vmem>>, %arg2: memref<256x128xbf16, #tpu.memory_space<vmem>>, %arg3: memref<16x1xf32, #tpu.memory_space<vmem>>, %arg4: memref<16x128xf32, #tpu.memory_space<vmem>>) attributes {dimension_semantics = [#tpu.dimension_semantics<parallel>], iteration_bounds = array<i64: 1>, scalar_prefetch = 0 : i64, scratch_operands = 0 : i64, tpu.core_type = #tpu.core_type<tc>, window_params = [{pipeline_mode = #tpu.pipeline_mode<synchronous>, transform_indices = @transform_0, window_bounds = array<i64: 16, 256>}, {transform_indices = @transform_1, window_bounds = array<i64: 256, 128>}, {pipeline_mode = #tpu.pipeline_mode<synchronous>, transform_indices = @transform_2, window_bounds = array<i64: 16, 1>}, {transform_indices = @transform_3, window_bounds = array<i64: 16, 128>}]} {
    %c0 = arith.constant 0 : index
    %c0_0 = arith.constant 0 : index
    %0 = vector.load %arg1[%c0, %c0_0] : memref<16x256xbf16, #tpu.memory_space<vmem>>, vector<16x256xbf16>
    %c0_1 = arith.constant 0 : index
    %c0_2 = arith.constant 0 : index
    %1 = vector.load %arg2[%c0_1, %c0_2] : memref<256x128xbf16, #tpu.memory_space<vmem>>, vector<256x128xbf16>
    %cst = arith.constant dense<0.000000e+00> : vector<16x128xf32>
    %2 = tpu.matmul %0, %1, %cst {dimension_numbers = #tpu.dot_dimension_numbers<[1], [0], [0], [1], [0, 0, 1, 1], [], []>} : vector<16x256xbf16>, vector<256x128xbf16>, vector<16x128xf32> -> vector<16x128xf32>
    %c0_3 = arith.constant 0 : index
    %c0_4 = arith.constant 0 : index
    %3 = vector.load %arg3[%c0_3, %c0_4] : memref<16x1xf32, #tpu.memory_space<vmem>>, vector<16x1xf32>
    %4 = vector.broadcast %3 : vector<16x1xf32> to vector<16x128xf32>
    %5 = arith.addf %2, %4 : vector<16x128xf32>
    %c0_5 = arith.constant 0 : index
    %c0_6 = arith.constant 0 : index
    %6 = vector.load %arg4[%c0_5, %c0_6] : memref<16x128xf32, #tpu.memory_space<vmem>>, vector<16x128xf32>
    tpu.vector_store %arg4[%c0_5, %c0_6], %5 {strides = array<i32>} : memref<16x128xf32, #tpu.memory_space<vmem>>, vector<16x128xf32>,
    return
  }
  func.func @transform_0(%arg0: i32) -> (i32, i32) {
    %c0_i32 = arith.constant 0 : i32
    %c0_i32_0 = arith.constant 0 : i32
    %c0_i32_1 = arith.constant 0 : i32
    return %c0_i32, %c0_i32_0 : i32, i32
  }
  func.func @transform_1(%arg0: i32) -> (i32, i32) {
    %c0_i32 = arith.constant 0 : i32
    %c0_i32_0 = arith.constant 0 : i32
    return %c0_i32, %arg0 : i32, i32
  }
  func.func @transform_2(%arg0: i32) -> (i32, i32) {
    %c0_i32 = arith.constant 0 : i32
    %c0_i32_0 = arith.constant 0 : i32
    %c0_i32_1 = arith.constant 0 : i32
    return %c0_i32, %c0_i32_0 : i32, i32
  }
  func.func @transform_3(%arg0: i32) -> (i32, i32) {
    %c0_i32 = arith.constant 0 : i32
    %c0_i32_0 = arith.constant 0 : i32
    return %c0_i32, %arg0 : i32, i32
  }
}

module attributes {stable_mosaic.version = 11 : i64} {
  func.func @_gemm_bias_act_kernel(%arg0: i32, %arg1: memref<256x8xbf16, #tpu.memory_space<vmem>>, %arg2: memref<8x128xbf16, #tpu.memory_space<vmem>>, %arg3: memref<256x1xf32, #tpu.memory_space<vmem>>, %arg4: memref<256x128xbf16, #tpu.memory_space<vmem>>) attributes {dimension_semantics = [#tpu.dimension_semantics<parallel>], iteration_bounds = array<i64: 1>, scalar_prefetch = 0 : i64, scratch_operands = 0 : i64, tpu.core_type = #tpu.core_type<tc>, window_params = [{pipeline_mode = #tpu.pipeline_mode<synchronous>, transform_indices = @transform_0, window_bounds = array<i64: 256, 8>}, {transform_indices = @transform_1, window_bounds = array<i64: 8, 128>}, {pipeline_mode = #tpu.pipeline_mode<synchronous>, transform_indices = @transform_2, window_bounds = array<i64: 256, 1>}, {transform_indices = @transform_3, window_bounds = array<i64: 256, 128>}]} {
    %c0 = arith.constant 0 : index
    %c0_0 = arith.constant 0 : index
    %0 = vector.load %arg1[%c0, %c0_0] : memref<256x8xbf16, #tpu.memory_space<vmem>>, vector<256x8xbf16>
    %c0_1 = arith.constant 0 : index
    %c0_2 = arith.constant 0 : index
    %1 = vector.load %arg2[%c0_1, %c0_2] : memref<8x128xbf16, #tpu.memory_space<vmem>>, vector<8x128xbf16>
    %cst = arith.constant dense<0.000000e+00> : vector<256x128xf32>
    %2 = tpu.matmul %0, %1, %cst {dimension_numbers = #tpu.dot_dimension_numbers<[1], [0], [0], [1], [0, 0, 1, 1], [], []>} : vector<256x8xbf16>, vector<8x128xbf16>, vector<256x128xf32> -> vector<256x128xf32>
    %c0_3 = arith.constant 0 : index
    %c0_4 = arith.constant 0 : index
    %3 = vector.load %arg3[%c0_3, %c0_4] : memref<256x1xf32, #tpu.memory_space<vmem>>, vector<256x1xf32>
    %4 = vector.broadcast %3 : vector<256x1xf32> to vector<256x128xf32>
    %5 = arith.addf %2, %4 : vector<256x128xf32>
    %6 = arith.truncf %5 : vector<256x128xf32> to vector<256x128xbf16>
    %c0_5 = arith.constant 0 : index
    %c0_6 = arith.constant 0 : index
    %7 = vector.load %arg4[%c0_5, %c0_6] : memref<256x128xbf16, #tpu.memory_space<vmem>>, vector<256x128xbf16>
    tpu.vector_store %arg4[%c0_5, %c0_6], %6 {strides = array<i32>} : memref<256x128xbf16, #tpu.memory_space<vmem>>, vector<256x128xbf16>,
    return
  }
  func.func @transform_0(%arg0: i32) -> (i32, i32) {
    %c0_i32 = arith.constant 0 : i32
    %c0_i32_0 = arith.constant 0 : i32
    %c0_i32_1 = arith.constant 0 : i32
    return %c0_i32, %c0_i32_0 : i32, i32
  }
  func.func @transform_1(%arg0: i32) -> (i32, i32) {
    %c0_i32 = arith.constant 0 : i32
    %c0_i32_0 = arith.constant 0 : i32
    return %c0_i32, %arg0 : i32, i32
  }
  func.func @transform_2(%arg0: i32) -> (i32, i32) {
    %c0_i32 = arith.constant 0 : i32
    %c0_i32_0 = arith.constant 0 : i32
    %c0_i32_1 = arith.constant 0 : i32
    return %c0_i32, %c0_i32_0 : i32, i32
  }
  func.func @transform_3(%arg0: i32) -> (i32, i32) {
    %c0_i32 = arith.constant 0 : i32
    %c0_i32_0 = arith.constant 0 : i32
    return %c0_i32, %arg0 : i32, i32
  }
}

module attributes {stable_mosaic.version = 11 : i64} {
  func.func @_gemm_bias_act_kernel(%arg0: i32, %arg1: memref<5x128xbf16, #tpu.memory_space<vmem>>, %arg2: memref<128x128xbf16, #tpu.memory_space<vmem>>, %arg3: memref<5x1xf32, #tpu.memory_space<vmem>>, %arg4: memref<5x128xf32, #tpu.memory_space<vmem>>) attributes {dimension_semantics = [#tpu.dimension_semantics<parallel>], iteration_bounds = array<i64: 1>, scalar_prefetch = 0 : i64, scratch_operands = 0 : i64, tpu.core_type = #tpu.core_type<tc>, window_params = [{pipeline_mode = #tpu.pipeline_mode<synchronous>, transform_indices = @transform_0, window_bounds = array<i64: 5, 128>}, {transform_indices = @transform_1, window_bounds = array<i64: 128, 128>}, {pipeline_mode = #tpu.pipeline_mode<synchronous>, transform_indices = @transform_2, window_bounds = array<i64: 5, 1>}, {transform_indices = @transform_3, window_bounds = array<i64: 5, 128>}]} {
    %c0 = arith.constant 0 : index
    %c0_0 = arith.constant 0 : index
    %0 = vector.load %arg1[%c0, %c0_0] : memref<5x128xbf16, #tpu.memory_space<vmem>>, vector<5x128xbf16>
    %c0_1 = arith.constant 0 : index
    %c0_2 = arith.constant 0 : index
    %1 = vector.load %arg2[%c0_1, %c0_2] : memref<128x128xbf16, #tpu.memory_space<vmem>>, vector<128x128xbf16>
    %cst = arith.constant dense<0.000000e+00> : vector<5x128xf32>
    %2 = tpu.matmul %0, %1, %cst {dimension_numbers = #tpu.dot_dimension_numbers<[1], [0], [0], [1], [0, 0, 1, 1], [], []>} : vector<5x128xbf16>, vector<128x128xbf16>, vector<5x128xf32> -> vector<5x128xf32>
    %c0_3 = arith.constant 0 : index
    %c0_4 = arith.constant 0 : index
    %3 = vector.load %arg3[%c0_3, %c0_4] : memref<5x1xf32, #tpu.memory_space<vmem>>, vector<5x1xf32>
    %4 = vector.broadcast %3 : vector<5x1xf32> to vector<5x128xf32>
    %5 = arith.addf %2, %4 : vector<5x128xf32>
    %c0_5 = arith.constant 0 : index
    %c0_6 = arith.constant 0 : index
    %6 = vector.load %arg4[%c0_5, %c0_6] : memref<5x128xf32, #tpu.memory_space<vmem>>, vector<5x128xf32>
    tpu.vector_store %arg4[%c0_5, %c0_6], %5 {strides = array<i32>} : memref<5x128xf32, #tpu.memory_space<vmem>>, vector<5x128xf32>,
    return
  }
  func.func @transform_0(%arg0: i32) -> (i32, i32) {
    %c0_i32 = arith.constant 0 : i32
    %c0_i32_0 = arith.constant 0 : i32
    %c0_i32_1 = arith.constant 0 : i32
    return %c0_i32, %c0_i32_0 : i32, i32
  }
  func.func @transform_1(%arg0: i32) -> (i32, i32) {
    %c0_i32 = arith.constant 0 : i32
    %c0_i32_0 = arith.constant 0 : i32
    return %c0_i32, %arg0 : i32, i32
  }
  func.func @transform_2(%arg0: i32) -> (i32, i32) {
    %c0_i32 = arith.constant 0 : i32
    %c0_i32_0 = arith.constant 0 : i32
    %c0_i32_1 = arith.constant 0 : i32
    return %c0_i32, %c0_i32_0 : i32, i32
  }
  func.func @transform_3(%arg0: i32) -> (i32, i32) {
    %c0_i32 = arith.constant 0 : i32
    %c0_i32_0 = arith.constant 0 : i32
    return %c0_i32, %arg0 : i32, i32
  }
}

module attributes {stable_mosaic.version = 11 : i64} {
  func.func @_gemm_bias_act_kernel(%arg0: i32, %arg1: memref<32x144xbf16, #tpu.memory_space<vmem>>, %arg2: memref<144x128xbf16, #tpu.memory_space<vmem>>, %arg3: memref<32x1xf32, #tpu.memory_space<vmem>>, %arg4: memref<32x128xbf16, #tpu.memory_space<vmem>>) attributes {dimension_semantics = [#tpu.dimension_semantics<parallel>], iteration_bounds = array<i64: 1>, scalar_prefetch = 0 : i64, scratch_operands = 0 : i64, tpu.core_type = #tpu.core_type<tc>, window_params = [{pipeline_mode = #tpu.pipeline_mode<synchronous>, transform_indices = @transform_0, window_bounds = array<i64: 32, 144>}, {transform_indices = @transform_1, window_bounds = array<i64: 144, 128>}, {pipeline_mode = #tpu.pipeline_mode<synchronous>, transform_indices = @transform_2, window_bounds = array<i64: 32, 1>}, {transform_indices = @transform_3, window_bounds = array<i64: 32, 128>}]} {
    %c0 = arith.constant 0 : index
    %c0_0 = arith.constant 0 : index
    %0 = vector.load %arg1[%c0, %c0_0] : memref<32x144xbf16, #tpu.memory_space<vmem>>, vector<32x144xbf16>
    %c0_1 = arith.constant 0 : index
    %c0_2 = arith.constant 0 : index
    %1 = vector.load %arg2[%c0_1, %c0_2] : memref<144x128xbf16, #tpu.memory_space<vmem>>, vector<144x128xbf16>
    %cst = arith.constant dense<0.000000e+00> : vector<32x128xf32>
    %2 = tpu.matmul %0, %1, %cst {dimension_numbers = #tpu.dot_dimension_numbers<[1], [0], [0], [1], [0, 0, 1, 1], [], []>} : vector<32x144xbf16>, vector<144x128xbf16>, vector<32x128xf32> -> vector<32x128xf32>
    %c0_3 = arith.constant 0 : index
    %c0_4 = arith.constant 0 : index
    %3 = vector.load %arg3[%c0_3, %c0_4] : memref<32x1xf32, #tpu.memory_space<vmem>>, vector<32x1xf32>
    %4 = vector.broadcast %3 : vector<32x1xf32> to vector<32x128xf32>
    %5 = arith.addf %2, %4 : vector<32x128xf32>
    %cst_5 = arith.constant 0.000000e+00 : f32
    %6 = vector.broadcast %cst_5 : f32 to vector<32x128xf32>
    %7 = arith.maximumf %5, %6 : vector<32x128xf32>
    %8 = arith.truncf %7 : vector<32x128xf32> to vector<32x128xbf16>
    %c0_6 = arith.constant 0 : index
    %c0_7 = arith.constant 0 : index
    %9 = vector.load %arg4[%c0_6, %c0_7] : memref<32x128xbf16, #tpu.memory_space<vmem>>, vector<32x128xbf16>
    tpu.vector_store %arg4[%c0_6, %c0_7], %8 {strides = array<i32>} : memref<32x128xbf16, #tpu.memory_space<vmem>>, vector<32x128xbf16>,
    return
  }
  func.func @transform_0(%arg0: i32) -> (i32, i32) {
    %c0_i32 = arith.constant 0 : i32
    %c0_i32_0 = arith.constant 0 : i32
    %c0_i32_1 = arith.constant 0 : i32
    return %c0_i32, %c0_i32_0 : i32, i32
  }
  func.func @transform_1(%arg0: i32) -> (i32, i32) {
    %c0_i32 = arith.constant 0 : i32
    %c0_i32_0 = arith.constant 0 : i32
    return %c0_i32, %arg0 : i32, i32
  }
  func.func @transform_2(%arg0: i32) -> (i32, i32) {
    %c0_i32 = arith.constant 0 : i32
    %c0_i32_0 = arith.constant 0 : i32
    %c0_i32_1 = arith.constant 0 : i32
    return %c0_i32, %c0_i32_0 : i32, i32
  }
  func.func @transform_3(%arg0: i32) -> (i32, i32) {
    %c0_i32 = arith.constant 0 : i32
    %c0_i32_0 = arith.constant 0 : i32
    return %c0_i32, %arg0 : i32, i32
  }
}

module attributes {stable_mosaic.version = 11 : i64} {
  func.func @_gemm_bias_act_kernel(%arg0: i32, %arg1: memref<16x72xbf16, #tpu.memory_space<vmem>>, %arg2: memref<72x128xbf16, #tpu.memory_space<vmem>>, %arg3: memref<16x1xf32, #tpu.memory_space<vmem>>, %arg4: memref<16x128xbf16, #tpu.memory_space<vmem>>) attributes {dimension_semantics = [#tpu.dimension_semantics<parallel>], iteration_bounds = array<i64: 1>, scalar_prefetch = 0 : i64, scratch_operands = 0 : i64, tpu.core_type = #tpu.core_type<tc>, window_params = [{pipeline_mode = #tpu.pipeline_mode<synchronous>, transform_indices = @transform_0, window_bounds = array<i64: 16, 72>}, {transform_indices = @transform_1, window_bounds = array<i64: 72, 128>}, {pipeline_mode = #tpu.pipeline_mode<synchronous>, transform_indices = @transform_2, window_bounds = array<i64: 16, 1>}, {transform_indices = @transform_3, window_bounds = array<i64: 16, 128>}]} {
    %c0 = arith.constant 0 : index
    %c0_0 = arith.constant 0 : index
    %0 = vector.load %arg1[%c0, %c0_0] : memref<16x72xbf16, #tpu.memory_space<vmem>>, vector<16x72xbf16>
    %c0_1 = arith.constant 0 : index
    %c0_2 = arith.constant 0 : index
    %1 = vector.load %arg2[%c0_1, %c0_2] : memref<72x128xbf16, #tpu.memory_space<vmem>>, vector<72x128xbf16>
    %cst = arith.constant dense<0.000000e+00> : vector<16x128xf32>
    %2 = tpu.matmul %0, %1, %cst {dimension_numbers = #tpu.dot_dimension_numbers<[1], [0], [0], [1], [0, 0, 1, 1], [], []>} : vector<16x72xbf16>, vector<72x128xbf16>, vector<16x128xf32> -> vector<16x128xf32>
    %c0_3 = arith.constant 0 : index
    %c0_4 = arith.constant 0 : index
    %3 = vector.load %arg3[%c0_3, %c0_4] : memref<16x1xf32, #tpu.memory_space<vmem>>, vector<16x1xf32>
    %4 = vector.broadcast %3 : vector<16x1xf32> to vector<16x128xf32>
    %5 = arith.addf %2, %4 : vector<16x128xf32>
    %cst_5 = arith.constant 0.000000e+00 : f32
    %6 = vector.broadcast %cst_5 : f32 to vector<16x128xf32>
    %7 = arith.maximumf %5, %6 : vector<16x128xf32>
    %8 = arith.truncf %7 : vector<16x128xf32> to vector<16x128xbf16>
    %c0_6 = arith.constant 0 : index
    %c0_7 = arith.constant 0 : index
    %9 = vector.load %arg4[%c0_6, %c0_7] : memref<16x128xbf16, #tpu.memory_space<vmem>>, vector<16x128xbf16>
    tpu.vector_store %arg4[%c0_6, %c0_7], %8 {strides = array<i32>} : memref<16x128xbf16, #tpu.memory_space<vmem>>, vector<16x128xbf16>,
    return
  }
  func.func @transform_0(%arg0: i32) -> (i32, i32) {
    %c0_i32 = arith.constant 0 : i32
    %c0_i32_0 = arith.constant 0 : i32
    %c0_i32_1 = arith.constant 0 : i32
    return %c0_i32, %c0_i32_0 : i32, i32
  }
  func.func @transform_1(%arg0: i32) -> (i32, i32) {
    %c0_i32 = arith.constant 0 : i32
    %c0_i32_0 = arith.constant 0 : i32
    return %c0_i32, %arg0 : i32, i32
  }
  func.func @transform_2(%arg0: i32) -> (i32, i32) {
    %c0_i32 = arith.constant 0 : i32
    %c0_i32_0 = arith.constant 0 : i32
    %c0_i32_1 = arith.constant 0 : i32
    return %c0_i32, %c0_i32_0 : i32, i32
  }
  func.func @transform_3(%arg0: i32) -> (i32, i32) {
    %c0_i32 = arith.constant 0 : i32
    %c0_i32_0 = arith.constant 0 : i32
    return %c0_i32, %arg0 : i32, i32
  }
}

module attributes {stable_mosaic.version = 11 : i64} {
  func.func @_gemm_bias_act_kernel(%arg0: i32, %arg1: memref<4x36xbf16, #tpu.memory_space<vmem>>, %arg2: memref<36x512xbf16, #tpu.memory_space<vmem>>, %arg3: memref<4x1xf32, #tpu.memory_space<vmem>>, %arg4: memref<4x512xf32, #tpu.memory_space<vmem>>) attributes {dimension_semantics = [#tpu.dimension_semantics<parallel>], iteration_bounds = array<i64: 1>, scalar_prefetch = 0 : i64, scratch_operands = 0 : i64, tpu.core_type = #tpu.core_type<tc>, window_params = [{pipeline_mode = #tpu.pipeline_mode<synchronous>, transform_indices = @transform_0, window_bounds = array<i64: 4, 36>}, {transform_indices = @transform_1, window_bounds = array<i64: 36, 512>}, {pipeline_mode = #tpu.pipeline_mode<synchronous>, transform_indices = @transform_2, window_bounds = array<i64: 4, 1>}, {transform_indices = @transform_3, window_bounds = array<i64: 4, 512>}]} {
    %c0 = arith.constant 0 : index
    %c0_0 = arith.constant 0 : index
    %0 = vector.load %arg1[%c0, %c0_0] : memref<4x36xbf16, #tpu.memory_space<vmem>>, vector<4x36xbf16>
    %c0_1 = arith.constant 0 : index
    %c0_2 = arith.constant 0 : index
    %1 = vector.load %arg2[%c0_1, %c0_2] : memref<36x512xbf16, #tpu.memory_space<vmem>>, vector<36x512xbf16>
    %cst = arith.constant dense<0.000000e+00> : vector<4x512xf32>
    %2 = tpu.matmul %0, %1, %cst {dimension_numbers = #tpu.dot_dimension_numbers<[1], [0], [0], [1], [0, 0, 1, 1], [], []>} : vector<4x36xbf16>, vector<36x512xbf16>, vector<4x512xf32> -> vector<4x512xf32>
    %c0_3 = arith.constant 0 : index
    %c0_4 = arith.constant 0 : index
    %3 = vector.load %arg3[%c0_3, %c0_4] : memref<4x1xf32, #tpu.memory_space<vmem>>, vector<4x1xf32>
    %4 = vector.broadcast %3 : vector<4x1xf32> to vector<4x512xf32>
    %5 = arith.addf %2, %4 : vector<4x512xf32>
    %6 = arith.negf %5 : vector<4x512xf32>
    %7 = math.exp %6 : vector<4x512xf32>
    %cst_5 = arith.constant 1.000000e+00 : f32
    %8 = vector.broadcast %cst_5 : f32 to vector<4x512xf32>
    %9 = arith.addf %8, %7 : vector<4x512xf32>
    %10 = arith.divf %8, %9 : vector<4x512xf32>
    %c0_6 = arith.constant 0 : index
    %c0_7 = arith.constant 0 : index
    %11 = vector.load %arg4[%c0_6, %c0_7] : memref<4x512xf32, #tpu.memory_space<vmem>>, vector<4x512xf32>
    tpu.vector_store %arg4[%c0_6, %c0_7], %10 {strides = array<i32>} : memref<4x512xf32, #tpu.memory_space<vmem>>, vector<4x512xf32>,
    return
  }
  func.func @transform_0(%arg0: i32) -> (i32, i32) {
    %c0_i32 = arith.constant 0 : i32
    %c0_i32_0 = arith.constant 0 : i32
    %c0_i32_1 = arith.constant 0 : i32
    return %c0_i32, %c0_i32_0 : i32, i32
  }
  func.func @transform_1(%arg0: i32) -> (i32, i32) {
    %c0_i32 = arith.constant 0 : i32
    %c0_i32_0 = arith.constant 0 : i32
    return %c0_i32, %arg0 : i32, i32
  }
  func.func @transform_2(%arg0: i32) -> (i32, i32) {
    %c0_i32 = arith.constant 0 : i32
    %c0_i32_0 = arith.constant 0 : i32
    %c0_i32_1 = arith.constant 0 : i32
    return %c0_i32, %c0_i32_0 : i32, i32
  }
  func.func @transform_3(%arg0: i32) -> (i32, i32) {
    %c0_i32 = arith.constant 0 : i32
    %c0_i32_0 = arith.constant 0 : i32
    return %c0_i32, %arg0 : i32, i32
  }
}

</mosaic_0001>

<bundles_post_ra>
// kernel: vae_forward.10
= control target key start
LH: loop header
LB: loop body
LE: loop exit
PB: predicated region body
PF: predicated region fallthrough
CT: control target
= control target key end

     0   :  { %v184_v1 = vmov 0   ;;  %vm46_vm0 = vcmask 130048   ;;  %v185_v7 = vmov 1983009808   ;;  %v149_v9 = vlaneseq  ;;  %s227_s1 = inlined_call_operand.vmem [shape: bf16[16,512], index: 1, kind: input, shape index: {}]   ;;  %s228_s2 = inlined_call_operand.vmem [shape: f32[4,1], index: 2, kind: input, shape index: {}]   ;;  %s229_s0 = inlined_call_operand.vmem [shape: bf16[4,16], index: 0, kind: input, shape index: {}]   ;;  %s230_s3 = inlined_call_operand.vmem [shape: bf16[4,512], index: 3, kind: output, shape index: {}]  }
   0x1   :  { %v178_v0 = vld [vmem:[%s227_s1 + $0x4] ss:$16 sps:$4 sm:$0xff]   ;;  %82 = vmatprep.mubr.bf16.mxu0 %v184_v1  ;;  %123 = vmatprep.mubr.bf16.mxu1 %v184_v1  ;;  %v180_v2 = vld [vmem:[%s227_s1 + $0xc] ss:$16 sps:$4 sm:$0xff]   ;;  %v182_v3 = vld [vmem:[%s227_s1] ss:$16 sps:$4 sm:$0xff]   ;;  %v147_v8 = vunpack.c.l.s4 %v185_v7 }
   0x2   :  { %177 = vset.pattern.permute.xlu0 %v184_v1  ;;  %50 = vmatprep.subr.bf16.mxu0 %v178_v0  ;;  %v183_v4 = vld [vmem:[%s227_s1 + $0x8] ss:$16 sps:$4 sm:$0xff]   ;;  %v20_v5 = vld [vmem:[%s228_s2] sm:$0xf]  ;;  %v150_v14 = vshrl.u32 %v149_v9, 7 }
   0x3   :  { %91 = vmatprep.subr.bf16.mxu1 %v180_v2  ;;  %51 = vmatpush1.bf16.msra.mxu0 %v182_v3  ;;  %v15_v6 = vld [vmem:[%s229_s0] sm:$0x3]  ;;  %v148_v13 = vunpack.c.0.s8 %v147_v8 }
   0x4   :  { %92 = vmatpush1.bf16.msra.mxu1 %v183_v4  ;;  %23 = vperm.xlu0 %177, %v20_v5  }
   0x5   :  { %v151_v28 = vsub.s32 %v148_v13, %v150_v14 }
   0x6   :  { %171 = vmatmul.mubr.msk.bf16.vlgmr.msra.gmra.mrb[0].mxu0 %vm46_vm0, %v15_v6 }
   0x7   :  { %172 = vmatmul.mubr.msk.bf16.vlgmr.msra.gmra.mrb[0].mxu1 %vm46_vm0, %v15_v6 }
  0x83   :  { %v24_v10 = vpop.permute.xlu0 %23 }
  0xd9   :  { %v84_v11 = vpop.f32.mrb[0].mxu0 }
  0xda   :  { %v125_v12 = vpop.f32.mrb[0].mxu1  ;;  %v85_v15 = vadd.f32 %v84_v11, %v24_v10  ;;  %v86_v17 = vpop.f32.mrb[1].mxu0 }
  0xdb   :  { %v126_v16 = vadd.f32 %v125_v12, %v24_v10  ;;  %v127_v18 = vpop.f32.mrb[1].mxu1  ;;  %v87_v19 = vadd.f32 %v86_v17, %v24_v10  ;;  %v88_v21 = vpop.f32.mrb[2].mxu0 }
  0xdc   :  { %v128_v20 = vadd.f32 %v127_v18, %v24_v10  ;;  %v129_v22 = vpop.f32.mrb[2].mxu1  ;;  %v132_v23 = vmax.f32 %v85_v15, 0.0  ;;  %v89_v25 = vpop.f32.mrb[3].mxu0 }
  0xdd   :  { %v134_v24 = vmax.f32 %v126_v16, 0.0  ;;  %v130_v26 = vpop.f32.mrb[3].mxu1  ;;  %v133_v27 = vmax.f32 %v87_v19, 0.0 }
  0xde   :  { %v135_v29 = vmax.f32 %v128_v20, 0.0 }
  0xdf   :  { %v173_v30 = vpack.c.bf16 %v133_v27, %v132_v23 }
  0xe0   :  { %v174_v31 = vpack.c.bf16 %v135_v29, %v134_v24 }
  0xe1   :  { %v152_v32 = vrot.slane %v173_v30, %v151_v28 }
  0xe2   :  { %v159_v33 = vrot.slane %v174_v31, %v151_v28 }
  0xe4   :  { %v160_v34 = vcombine.low %v152_v32, %v159_v33 }
  0xe6   :  { %162 = vst [vmem:[%s230_s3] sm:$0xff] %v160_v34 }

// kernel: vae_forward.11
= control target key start
LH: loop header
LB: loop body
LE: loop exit
PB: predicated region body
PF: predicated region fallthrough
CT: control target
= control target key end

     0   :  { %v135_v0 = vmov 0.0   ;;  %vm136_vm0 = vmmov 0   ;;  %v137_v2 = vmov 0   ;;  %vm54_vm1 = vcmask 523264   ;;  %s179_s1 = inlined_call_operand.vmem [shape: bf16[64,128], index: 1, kind: input, shape index: {}]   ;;  %s180_s2 = inlined_call_operand.vmem [shape: f32[8,1], index: 2, kind: input, shape index: {}]   ;;  %s181_s0 = inlined_call_operand.vmem [shape: bf16[8,64], index: 0, kind: input, shape index: {}]   ;;  %s182_s3 = inlined_call_operand.vmem [shape: bf16[8,128], index: 3, kind: output, shape index: {}]  }
   0x1   :  { %115 = vmatprep.subr.bf16.mxu0 %v135_v0  ;;  %v131_v1 = vld [vmem:[%s179_s1] sm:$0xff]   ;;  %123 = vmatprep.mubr.msk.bf16.mxu0 %vm136_vm0, %v135_v0  ;;  %v132_v3 = vld [vmem:[%s179_s1 + $0x8] sm:$0xff]   ;;  %v133_v5 = vld [vmem:[%s179_s1 + $0x10] sm:$0xff]  }
   0x2   :  { %130 = vset.pattern.permute.xlu0 %v137_v2  ;;  %116 = vmatpush3.bf16.msra.mxu0 %v131_v1  ;;  %v24_v4 = vld [vmem:[%s180_s2] sm:$0xff]  ;;  %v134_v6 = vld [vmem:[%s179_s1 + $0x18] sm:$0xff]  }
   0x3   :  { %117 = vmatprep.subr.bf16.mxu0 %v135_v0  ;;  %27 = vperm.xlu0 %130, %v24_v4   ;;  %v15_v7 = vld [vmem:[%s181_s0] sm:$0xf] }
   0x6   :  { %118 = vmatpush3.bf16.msra.mxu0 %v132_v3 }
   0x7   :  { %119 = vmatprep.subr.bf16.mxu0 %v135_v0 }
   0xa   :  { %120 = vmatpush3.bf16.msra.mxu0 %v133_v5 }
   0xb   :  { %121 = vmatprep.subr.bf16.mxu0 %v135_v0 }
   0xe   :  { %122 = vmatpush3.bf16.msra.mxu0 %v134_v6 }
  0x11   :  { %124 = vmatmul.mubr.msk.bf16.vlgmr.msra.gmra.mrb[0].mxu0 %vm54_vm1, %v15_v7 }
  0x82   :  { %v28_v8 = vpop.permute.xlu0 %27 }
  0xe4   :  { %v92_v9 = vpop.f32.mrb[0].mxu0 }
  0xe5   :  { %v93_v10 = vadd.f32 %v92_v9, %v28_v8  ;;  %v125_v11 = vpop.f32.mrb[1].mxu0 }
  0xe6   :  { %v95_v12 = vpop.f32.mrb[2].mxu0 }
  0xe7   :  { %v98_v13 = vmax.f32 %v93_v10, 0.0  ;;  %v126_v14 = vpop.f32.mrb[3].mxu0 }
  0xe9   :  { %v99_v15 = vpack.c.bf16 %v98_v13, %v98_v13 }
  0xeb   :  { %100 = vst [vmem:[%s182_s3] sm:$0xf] %v99_v15 }

// kernel: vae_forward.12
= control target key start
LH: loop header
LB: loop body
LE: loop exit
PB: predicated region body
PF: predicated region fallthrough
CT: control target
= control target key end

     0   :  { %v216_v0 = vmov 0.0   ;;  %vm217_vm0 = vmmov 0   ;;  %v218_v2 = vmov 0   ;;  %s275_s1 = inlined_call_operand.vmem [shape: bf16[128,128], index: 1, kind: input, shape index: {}]   ;;  %s276_s2 = inlined_call_operand.vmem [shape: f32[16,1], index: 2, kind: input, shape index: {}]   ;;  %s277_s0 = inlined_call_operand.vmem [shape: bf16[16,128], index: 0, kind: input, shape index: {}]   ;;  %s278_s3 = inlined_call_operand.vmem [shape: bf16[16,128], index: 3, kind: output, shape index: {}]  }
   0x1   :  { %183 = vmatprep.subr.bf16.mxu0 %v216_v0  ;;  %v207_v1 = vld [vmem:[%s275_s1] sm:$0xff]   ;;  %199 = vmatprep.mubr.msk.bf16.mxu0 %vm217_vm0, %v216_v0  ;;  %v208_v3 = vld [vmem:[%s275_s1 + $0x8] sm:$0xff]   ;;  %v209_v4 = vld [vmem:[%s275_s1 + $0x10] sm:$0xff]  }
   0x2   :  { %206 = vset.pattern.permute.xlu0 %v218_v2  ;;  %184 = vmatpush3.bf16.msra.mxu0 %v207_v1  ;;  %v33_v5 = vld [vmem:[%s276_s2] sm:$0xff]  ;;  %v210_v6 = vld [vmem:[%s275_s1 + $0x18] sm:$0xff]   ;;  %v34_v7 = vld [vmem:[%s276_s2 + $0x8] sm:$0xff] }
   0x3   :  { %185 = vmatprep.subr.bf16.mxu0 %v216_v0  ;;  %37 = vperm.xlu0 %206, %v33_v5   ;;  %v211_v8 = vld [vmem:[%s275_s1 + $0x20] sm:$0xff]   ;;  %v212_v9 = vld [vmem:[%s275_s1 + $0x28] sm:$0xff]   ;;  %v213_v10 = vld [vmem:[%s275_s1 + $0x30] sm:$0xff]  }
   0x4   :  { %v214_v11 = vld [vmem:[%s275_s1 + $0x38] sm:$0xff]   ;;  %v215_v12 = vld [vmem:[%s277_s0] sm:$0xff]  }
   0x6   :  { %186 = vmatpush3.bf16.msra.mxu0 %v208_v3 }
   0x7   :  { %187 = vmatprep.subr.bf16.mxu0 %v216_v0  ;;  %42 = vperm.xlu0 %206, %v34_v7  }
   0xa   :  { %188 = vmatpush3.bf16.msra.mxu0 %v209_v4 }
   0xb   :  { %189 = vmatprep.subr.bf16.mxu0 %v216_v0 }
   0xe   :  { %190 = vmatpush3.bf16.msra.mxu0 %v210_v6 }
   0xf   :  { %191 = vmatprep.subr.bf16.mxu0 %v216_v0 }
  0x12   :  { %192 = vmatpush3.bf16.msra.mxu0 %v211_v8 }
  0x13   :  { %193 = vmatprep.subr.bf16.mxu0 %v216_v0 }
  0x16   :  { %194 = vmatpush3.bf16.msra.mxu0 %v212_v9 }
  0x17   :  { %195 = vmatprep.subr.bf16.mxu0 %v216_v0 }
  0x1a   :  { %196 = vmatpush3.bf16.msra.mxu0 %v213_v10 }
  0x1b   :  { %197 = vmatprep.subr.bf16.mxu0 %v216_v0 }
  0x1e   :  { %198 = vmatpush3.bf16.msra.mxu0 %v214_v11 }
  0x21   :  { %200 = vmatmul.mubr.bf16.vlgmr.msra.gmra.mrb[0].mxu0 %v215_v12 }
  0x82   :  { %v38_v13 = vpop.permute.xlu0 %37 }
  0x86   :  { %v43_v17 = vpop.permute.xlu0 %42 }
  0xf4   :  { %v133_v14 = vpop.f32.mrb[0].mxu0 }
  0xf5   :  { %v134_v15 = vadd.f32 %v133_v14, %v38_v13  ;;  %v201_v16 = vpop.f32.mrb[1].mxu0 }
  0xf6   :  { %v136_v18 = vpop.f32.mrb[2].mxu0 }
  0xf7   :  { %v137_v19 = vadd.f32 %v136_v18, %v43_v17  ;;  %v202_v20 = vpop.f32.mrb[3].mxu0  ;;  %v140_v21 = vmax.f32 %v134_v15, 0.0 }
  0xf9   :  { %v141_v22 = vmax.f32 %v137_v19, 0.0 }
  0xfb   :  { %v172_v23 = vpack.c.bf16 %v141_v22, %v140_v21 }
  0xfd   :  { %173 = vst [vmem:[%s278_s3] sm:$0xff] %v172_v23  }

// kernel: vae_forward.14
= control target key start
LH: loop header
LB: loop body
LE: loop exit
PB: predicated region body
PF: predicated region fallthrough
CT: control target
= control target key end

     0   :  { %vm193_vm0 = vcmask 1043456   ;;  %vm168_vm1 = vcmask 64512   ;;  %v388_v1 = vmov 0   ;;  %s540_s1 = inlined_call_operand.vmem [shape: bf16[8,128], index: 1, kind: input, shape index: {}]   ;;  %s541_s0 = inlined_call_operand.vmem [shape: bf16[128,8], index: 0, kind: input, shape index: {}]   ;;  %s542_s2 = inlined_call_operand.vmem [shape: f32[128,1], index: 2, kind: input, shape index: {}]   ;;  %s543_s3 = inlined_call_operand.vmem [shape: f32[128,128], index: 3, kind: output, shape index: {}]  }
   0x1   :  { %v31_v0 = vld [vmem:[%s540_s1] sm:$0xf]  ;;  %379 = vset.pattern.permute.xlu1 %v388_v1  ;;  %378 = vset.pattern.permute.xlu0 %v388_v1  ;;  %v382_v5 = vld [vmem:[%s541_s0 + $0x8] sm:$0xff]   ;;  %v384_v7 = vld [vmem:[%s541_s0 + $0x10] sm:$0xff]  }
   0x2   :  { %375 = vmatprep.subr.msk.bf16.mxu0 %vm193_vm0, %v31_v0  ;;  %376 = vmatprep.subr.msk.bf16.mxu1 %vm193_vm0, %v31_v0  ;;  %v195_v2 = vsel %vm193_vm0, %v31_v0, 0  ;;  %v380_v3 = vld [vmem:[%s541_s0] sm:$0xff]   ;;  %v383_v6 = vld [vmem:[%s541_s0 + $0x28] sm:$0xff]   ;;  %v385_v8 = vld [vmem:[%s541_s0 + $0x30] sm:$0xff]  }
   0x3   :  { %356 = vmatpush3.bf16.msra.mxu0 %v195_v2  ;;  %374 = vmatpush3.bf16.msra.mxu1 %v195_v2  ;;  %v381_v4 = vld [vmem:[%s541_s0 + $0x20] sm:$0xff]   ;;  %v34_v9 = vld [vmem:[%s542_s2 + $0x10] sm:$0xff]  ;;  %v386_v11 = vld [vmem:[%s541_s0 + $0x18] sm:$0xff]  }
   0x4   :  { %357 = vmatprep.mubr.msk.bf16.mxu0 %vm168_vm1, %v380_v3  ;;  %365 = vmatprep.mubr.msk.bf16.mxu1 %vm168_vm1, %v381_v4  ;;  %v32_v10 = vld [vmem:[%s542_s2] sm:$0xff]  ;;  %v387_v12 = vld [vmem:[%s541_s0 + $0x38] sm:$0xff]   ;;  %v33_v14 = vld [vmem:[%s542_s2 + $0x8] sm:$0xff] }
   0x5   :  { %60 = vperm.xlu1 %379, %v34_v9   ;;  %50 = vperm.xlu0 %378, %v32_v10   ;;  %v35_v13 = vld [vmem:[%s542_s2 + $0x18] sm:$0xff]  ;;  %v37_v15 = vld [vmem:[%s542_s2 + $0x28] sm:$0xff]  ;;  %v36_v16 = vld [vmem:[%s542_s2 + $0x20] sm:$0xff] }
   0x6   :  { %358 = vmatmul.mubr.msk.bf16.vlgmr.msra.gmra.mrb[0].mxu0 %vm168_vm1, %v382_v5  ;;  %366 = vmatmul.mubr.msk.bf16.vlgmr.msra.gmra.mrb[0].mxu1 %vm168_vm1, %v383_v6  ;;  %v39_v17 = vld [vmem:[%s542_s2 + $0x38] sm:$0xff]  ;;  %v38_v18 = vld [vmem:[%s542_s2 + $0x30] sm:$0xff]  ;;  %v41_v19 = vld [vmem:[%s542_s2 + $0x48] sm:$0xff] }
   0x7   :  { %361 = vmatprep.mubr.msk.bf16.mxu0 %vm168_vm1, %v384_v7  ;;  %369 = vmatprep.mubr.msk.bf16.mxu1 %vm168_vm1, %v385_v8  ;;  %v40_v20 = vld [vmem:[%s542_s2 + $0x40] sm:$0xff]  ;;  %v43_v21 = vld [vmem:[%s542_s2 + $0x58] sm:$0xff]  ;;  %v42_v22 = vld [vmem:[%s542_s2 + $0x50] sm:$0xff] }
   0x8   :  { %v45_v23 = vld [vmem:[%s542_s2 + $0x68] sm:$0xff]  ;;  %v44_v24 = vld [vmem:[%s542_s2 + $0x60] sm:$0xff]  ;;  %v47_v25 = vld [vmem:[%s542_s2 + $0x78] sm:$0xff] }
   0x9   :  { %65 = vperm.xlu1 %379, %v35_v13   ;;  %55 = vperm.xlu0 %378, %v33_v14   ;;  %v46_v26 = vld [vmem:[%s542_s2 + $0x70] sm:$0xff] }
   0xd   :  { %75 = vperm.xlu1 %379, %v37_v15   ;;  %70 = vperm.xlu0 %378, %v36_v16  }
   0xe   :  { %362 = vmatmul.mubr.msk.bf16.gmra.mrb[4].mxu0 %vm168_vm1, %v386_v11  ;;  %370 = vmatmul.mubr.msk.bf16.gmra.mrb[4].mxu1 %vm168_vm1, %v387_v12 }
  0x11   :  { %85 = vperm.xlu1 %379, %v39_v17   ;;  %80 = vperm.xlu0 %378, %v38_v18  }
  0x15   :  { %95 = vperm.xlu1 %379, %v41_v19   ;;  %90 = vperm.xlu0 %378, %v40_v20  }
  0x19   :  { %105 = vperm.xlu1 %379, %v43_v21   ;;  %100 = vperm.xlu0 %378, %v42_v22  }
  0x1d   :  { %115 = vperm.xlu1 %379, %v45_v23   ;;  %110 = vperm.xlu0 %378, %v44_v24  }
  0x21   :  { %125 = vperm.xlu1 %379, %v47_v25   ;;  %120 = vperm.xlu0 %378, %v46_v26  }
  0x84   :  { %v61_v27 = vpop.permute.xlu1 %60  ;;  %v51_v28 = vpop.permute.xlu0 %50 }
  0x88   :  { %v66_v29 = vpop.permute.xlu1 %65  ;;  %v56_v30 = vpop.permute.xlu0 %55 }
  0x8c   :  { %v76_v31 = vpop.permute.xlu1 %75  ;;  %v71_v32 = vpop.permute.xlu0 %70 }
  0x90   :  { %v86_v33 = vpop.permute.xlu1 %85  ;;  %v81_v34 = vpop.permute.xlu0 %80 }
  0x94   :  { %v96_v35 = vpop.permute.xlu1 %95  ;;  %v91_v36 = vpop.permute.xlu0 %90 }
  0x98   :  { %v106_v37 = vpop.permute.xlu1 %105  ;;  %v101_v38 = vpop.permute.xlu0 %100 }
  0x9c   :  { %v116_v39 = vpop.permute.xlu1 %115  ;;  %v111_v40 = vpop.permute.xlu0 %110 }
  0xa0   :  { %v126_v0 = vpop.permute.xlu1 %125  ;;  %v121_v2 = vpop.permute.xlu0 %120 }
  0xd9   :  { %v359_v41 = vpop.f32.mrb[0].mxu0  ;;  %v367_v43 = vpop.f32.mrb[0].mxu1 }
  0xda   :  { %v240_v42 = vadd.f32 %v359_v41, %v61_v27  ;;  %v231_v44 = vpop.f32.mrb[1].mxu0  ;;  %v272_v45 = vadd.f32 %v367_v43, %v101_v38  ;;  %v263_v47 = vpop.f32.mrb[1].mxu1 }
  0xdb   :  { %v232_v46 = vadd.f32 %v231_v44, %v51_v28  ;;  %v360_v48 = vpop.f32.mrb[2].mxu0  ;;  %v264_v50 = vadd.f32 %v263_v47, %v91_v36  ;;  %v368_v52 = vpop.f32.mrb[2].mxu1 }
  0xdc   :  { %v296_v49 = vmax.f32 %v240_v42, 0.0  ;;  %v243_v51 = vadd.f32 %v360_v48, %v66_v29  ;;  %v234_v53 = vpop.f32.mrb[3].mxu0  ;;  %v304_v54 = vmax.f32 %v272_v45, 0.0  ;;  %v275_v56 = vadd.f32 %v368_v52, %v106_v37  ;;  %v266_v58 = vpop.f32.mrb[3].mxu1 }
  0xdd   :  { %v294_v55 = vmax.f32 %v232_v46, 0.0  ;;  %v235_v57 = vadd.f32 %v234_v53, %v56_v30  ;;  %v302_v59 = vmax.f32 %v264_v50, 0.0  ;;  %v267_v61 = vadd.f32 %v266_v58, %v96_v35 }
  0xde   :  { %312 = vst [vmem:[%s543_s3 + $0x10] sm:$0xff] %v296_v49  ;;  %v297_v60 = vmax.f32 %v243_v51, 0.0  ;;  %320 = vst [vmem:[%s543_s3 + $0x50] sm:$0xff] %v304_v54  ;;  %v305_v62 = vmax.f32 %v275_v56, 0.0 }
  0xdf   :  { %310 = vst [vmem:[%s543_s3] sm:$0xff] %v294_v55  ;;  %v295_v63 = vmax.f32 %v235_v57, 0.0  ;;  %318 = vst [vmem:[%s543_s3 + $0x40] sm:$0xff] %v302_v59  ;;  %v303_v1 = vmax.f32 %v267_v61, 0.0 }
  0xe0   :  { %313 = vst [vmem:[%s543_s3 + $0x18] sm:$0xff] %v297_v60  ;;  %321 = vst [vmem:[%s543_s3 + $0x58] sm:$0xff] %v305_v62 }
  0xe1   :  { %311 = vst [vmem:[%s543_s3 + $0x8] sm:$0xff] %v295_v63  ;;  %v363_v3 = vpop.f32.mrb[4].mxu0  ;;  %319 = vst [vmem:[%s543_s3 + $0x48] sm:$0xff] %v303_v1  ;;  %v371_v5 = vpop.f32.mrb[4].mxu1 }
  0xe2   :  { %v256_v4 = vadd.f32 %v363_v3, %v81_v34  ;;  %v247_v6 = vpop.f32.mrb[5].mxu0  ;;  %v288_v7 = vadd.f32 %v371_v5, %v121_v2  ;;  %v279_v9 = vpop.f32.mrb[5].mxu1 }
  0xe3   :  { %v248_v8 = vadd.f32 %v247_v6, %v71_v32  ;;  %v364_v10 = vpop.f32.mrb[6].mxu0  ;;  %v280_v12 = vadd.f32 %v279_v9, %v111_v40  ;;  %v372_v14 = vpop.f32.mrb[6].mxu1 }
  0xe4   :  { %v300_v11 = vmax.f32 %v256_v4, 0.0  ;;  %v259_v13 = vadd.f32 %v364_v10, %v86_v33  ;;  %v250_v15 = vpop.f32.mrb[7].mxu0  ;;  %v308_v16 = vmax.f32 %v288_v7, 0.0  ;;  %v291_v18 = vadd.f32 %v372_v14, %v126_v0  ;;  %v282_v20 = vpop.f32.mrb[7].mxu1 }
  0xe5   :  { %v298_v17 = vmax.f32 %v248_v8, 0.0  ;;  %v251_v19 = vadd.f32 %v250_v15, %v76_v31  ;;  %v306_v21 = vmax.f32 %v280_v12, 0.0  ;;  %v283_v23 = vadd.f32 %v282_v20, %v116_v39 }
  0xe6   :  { %316 = vst [vmem:[%s543_s3 + $0x30] sm:$0xff] %v300_v11  ;;  %v301_v22 = vmax.f32 %v259_v13, 0.0  ;;  %324 = vst [vmem:[%s543_s3 + $0x70] sm:$0xff] %v308_v16  ;;  %v309_v24 = vmax.f32 %v291_v18, 0.0 }
  0xe7   :  { %314 = vst [vmem:[%s543_s3 + $0x20] sm:$0xff] %v298_v17  ;;  %v299_v25 = vmax.f32 %v251_v19, 0.0  ;;  %322 = vst [vmem:[%s543_s3 + $0x60] sm:$0xff] %v306_v21  ;;  %v307_v26 = vmax.f32 %v283_v23, 0.0 }
  0xe8   :  { %317 = vst [vmem:[%s543_s3 + $0x38] sm:$0xff] %v301_v22  ;;  %325 = vst [vmem:[%s543_s3 + $0x78] sm:$0xff] %v309_v24 }
  0xe9   :  { %315 = vst [vmem:[%s543_s3 + $0x28] sm:$0xff] %v299_v25  ;;  %323 = vst [vmem:[%s543_s3 + $0x68] sm:$0xff] %v307_v26 }

// kernel: vae_forward.13
= control target key start
LH: loop header
LB: loop body
LE: loop exit
PB: predicated region body
PF: predicated region fallthrough
CT: control target
= control target key end

     0   :  { %v275_v1 = vmov 0   ;;  %s362_s1 = inlined_call_operand.vmem [shape: bf16[256,128], index: 1, kind: input, shape index: {}]   ;;  %s363_s0 = inlined_call_operand.vmem [shape: bf16[16,256], index: 0, kind: input, shape index: {}]   ;;  %s364_s2 = inlined_call_operand.vmem [shape: f32[16,1], index: 2, kind: input, shape index: {}]   ;;  %s365_s3 = inlined_call_operand.vmem [shape: f32[16,128], index: 3, kind: output, shape index: {}]  }
   0x1   :  { %v256_v0 = vld [vmem:[%s362_s1 + $0x40] sm:$0xff]   ;;  %255 = vset.pattern.permute.xlu0 %v275_v1  ;;  %v258_v3 = vld [vmem:[%s362_s1 + $0x48] sm:$0xff]   ;;  %v260_v5 = vld [vmem:[%s362_s1 + $0x50] sm:$0xff]  }
   0x2   :  { %v257_v2 = vld [vmem:[%s362_s1] sm:$0xff]   ;;  %232 = vmatprep.subr.bf16.mxu0 %v256_v0  ;;  %v259_v4 = vld [vmem:[%s362_s1 + $0x8] sm:$0xff]   ;;  %v261_v6 = vld [vmem:[%s362_s1 + $0x10] sm:$0xff]  }
   0x3   :  { %233 = vmatpush3.bf16.msra.mxu0 %v257_v2  ;;  %v262_v7 = vld [vmem:[%s362_s1 + $0x58] sm:$0xff]   ;;  %v264_v9 = vld [vmem:[%s362_s1 + $0x60] sm:$0xff]   ;;  %v266_v11 = vld [vmem:[%s362_s1 + $0x68] sm:$0xff]  }
   0x4   :  { %234 = vmatprep.subr.bf16.mxu0 %v258_v3  ;;  %v263_v8 = vld [vmem:[%s362_s1 + $0x18] sm:$0xff]   ;;  %v265_v10 = vld [vmem:[%s362_s1 + $0x20] sm:$0xff]   ;;  %v267_v14 = vld [vmem:[%s362_s1 + $0x28] sm:$0xff]  }
   0x5   :  { %v274_v12 = vld [vmem:[%s363_s0 + $0x4] ss:$8 sps:$4 sm:$0xff]   ;;  %v268_v16 = vld [vmem:[%s362_s1 + $0x70] sm:$0xff]   ;;  %v270_v18 = vld [vmem:[%s362_s1 + $0x78] sm:$0xff]  }
   0x6   :  { %v49_v13 = vld [vmem:[%s364_s2] sm:$0xff]  ;;  %199 = vmatprep.mubr.bf16.mxu0 %v274_v12  ;;  %v50_v15 = vld [vmem:[%s364_s2 + $0x8] sm:$0xff]  ;;  %v269_v17 = vld [vmem:[%s362_s1 + $0x30] sm:$0xff]  }
   0x7   :  { %235 = vmatpush3.bf16.msra.mxu0 %v259_v4  ;;  %53 = vperm.xlu0 %255, %v49_v13   ;;  %v271_v19 = vld [vmem:[%s362_s1 + $0x38] sm:$0xff]   ;;  %v272_v20 = vld [vmem:[%s363_s0] ss:$8 sps:$4 sm:$0xff]  }
   0x8   :  { %236 = vmatprep.subr.bf16.mxu0 %v260_v5 }
   0xb   :  { %237 = vmatpush3.bf16.msra.mxu0 %v261_v6  ;;  %58 = vperm.xlu0 %255, %v50_v15  }
   0xc   :  { %238 = vmatprep.subr.bf16.mxu0 %v262_v7 }
   0xf   :  { %239 = vmatpush3.bf16.msra.mxu0 %v263_v8 }
  0x10   :  { %240 = vmatprep.subr.bf16.mxu0 %v264_v9 }
  0x13   :  { %241 = vmatpush3.bf16.msra.mxu0 %v265_v10 }
  0x14   :  { %242 = vmatprep.subr.bf16.mxu0 %v266_v11 }
  0x17   :  { %243 = vmatpush3.bf16.msra.mxu0 %v267_v14 }
  0x18   :  { %244 = vmatprep.subr.bf16.mxu0 %v268_v16 }
  0x1b   :  { %245 = vmatpush3.bf16.msra.mxu0 %v269_v17 }
  0x1c   :  { %246 = vmatprep.subr.bf16.mxu0 %v270_v18 }
  0x1f   :  { %247 = vmatpush3.bf16.msra.mxu0 %v271_v19 }
  0x22   :  { %200 = vmatmul.mubr.bf16.vlgmr.msra.gmra.mrb[0].mxu0 %v272_v20 }
  0x86   :  { %v54_v21 = vpop.permute.xlu0 %53 }
  0x8a   :  { %v59_v29 = vpop.permute.xlu0 %58 }
  0xf5   :  { %v248_v22 = vpop.f32.mrb[0].mxu0 }
  0xf6   :  { %v249_v23 = vpop.f32.mrb[1].mxu0 }
  0xf7   :  { %v250_v24 = vadd.f32 %v249_v23, %v248_v22  ;;  %v251_v25 = vpop.f32.mrb[2].mxu0 }
  0xf8   :  { %v252_v26 = vpop.f32.mrb[3].mxu0 }
  0xf9   :  { %v202_v27 = vadd.f32 %v250_v24, %v54_v21  ;;  %v253_v28 = vadd.f32 %v252_v26, %v251_v25 }
  0xfb   :  { %208 = vst [vmem:[%s365_s3] sm:$0xff] %v202_v27  ;;  %v205_v30 = vadd.f32 %v253_v28, %v59_v29 }
  0xfd   :  { %209 = vst [vmem:[%s365_s3 + $0x8] sm:$0xff] %v205_v30 }

// kernel: vae_forward.16
= control target key start
LH: loop header
LB: loop body
LE: loop exit
PB: predicated region body
PF: predicated region fallthrough
CT: control target
= control target key end

     0   :  { %vm369_vm0 = vcmask 1043456   ;;  %v963_v0 = vmov 0   ;;  %vm320_vm1 = vcmask 64512   ;;  %s1225_s2 = inlined_call_operand.vmem [shape: f32[256,1], index: 2, kind: input, shape index: {}]   ;;  %s1226_s1 = inlined_call_operand.vmem [shape: bf16[8,128], index: 1, kind: input, shape index: {}]   ;;  %s1227_s0 = inlined_call_operand.vmem [shape: bf16[256,8], index: 0, kind: input, shape index: {}]   ;;  %s1228_s3 = inlined_call_operand.vmem [shape: bf16[256,128], index: 3, kind: output, shape index: {}]  }
   0x1   :  { %946 = vset.pattern.permute.xlu1 %v963_v0  ;;  %945 = vset.pattern.permute.xlu0 %v963_v0  ;;  %v50_v1 = vld [vmem:[%s1225_s2 + $0x10] sm:$0xff]  ;;  %v48_v2 = vld [vmem:[%s1225_s2] sm:$0xff]  ;;  %v51_v7 = vld [vmem:[%s1225_s2 + $0x18] sm:$0xff] }
   0x2   :  { %v47_v3 = vld [vmem:[%s1226_s1] sm:$0xf]  ;;  %92 = vperm.xlu1 %946, %v50_v1   ;;  %82 = vperm.xlu0 %945, %v48_v2   ;;  %v49_v8 = vld [vmem:[%s1225_s2 + $0x8] sm:$0xff]  ;;  %v951_v13 = vld [vmem:[%s1227_s0 + $0x10] sm:$0xff]  }
   0x3   :  { %v371_v4 = vsel %vm369_vm0, %v47_v3, 0  ;;  %v947_v5 = vld [vmem:[%s1227_s0] sm:$0xff]   ;;  %942 = vmatprep.subr.msk.bf16.mxu0 %vm369_vm0, %v47_v3  ;;  %943 = vmatprep.subr.msk.bf16.mxu1 %vm369_vm0, %v47_v3  ;;  %v949_v9 = vld [vmem:[%s1227_s0 + $0x8] sm:$0xff]   ;;  %v952_v14 = vld [vmem:[%s1227_s0 + $0x50] sm:$0xff]  }
   0x4   :  { %v948_v6 = vld [vmem:[%s1227_s0 + $0x40] sm:$0xff]   ;;  %907 = vmatpush3.bf16.msra.mxu0 %v371_v4  ;;  %941 = vmatpush3.bf16.msra.mxu1 %v371_v4  ;;  %v950_v10 = vld [vmem:[%s1227_s0 + $0x48] sm:$0xff]   ;;  %v55_v15 = vld [vmem:[%s1225_s2 + $0x38] sm:$0xff] }
   0x5   :  { %908 = vmatprep.mubr.msk.bf16.mxu0 %vm320_vm1, %v947_v5  ;;  %924 = vmatprep.mubr.msk.bf16.mxu1 %vm320_vm1, %v948_v6  ;;  %v53_v11 = vld [vmem:[%s1225_s2 + $0x28] sm:$0xff]  ;;  %v52_v12 = vld [vmem:[%s1225_s2 + $0x20] sm:$0xff]  ;;  %v54_v16 = vld [vmem:[%s1225_s2 + $0x30] sm:$0xff] }
   0x6   :  { %97 = vperm.xlu1 %946, %v51_v7   ;;  %87 = vperm.xlu0 %945, %v49_v8   ;;  %v953_v17 = vld [vmem:[%s1227_s0 + $0x18] sm:$0xff]   ;;  %v955_v19 = vld [vmem:[%s1227_s0 + $0x20] sm:$0xff]   ;;  %v57_v20 = vld [vmem:[%s1225_s2 + $0x48] sm:$0xff] }
   0x7   :  { %909 = vmatmul.mubr.msk.bf16.vlgmr.msra.gmra.mrb[0].mxu0 %vm320_vm1, %v949_v9  ;;  %925 = vmatmul.mubr.msk.bf16.vlgmr.msra.gmra.mrb[0].mxu1 %vm320_vm1, %v950_v10  ;;  %v954_v18 = vld [vmem:[%s1227_s0 + $0x58] sm:$0xff]   ;;  %v956_v21 = vld [vmem:[%s1227_s0 + $0x60] sm:$0xff]   ;;  %v58_v24 = vld [vmem:[%s1225_s2 + $0x50] sm:$0xff] }
   0x8   :  { %912 = vmatprep.mubr.msk.bf16.mxu0 %vm320_vm1, %v951_v13  ;;  %928 = vmatprep.mubr.msk.bf16.mxu1 %vm320_vm1, %v952_v14  ;;  %v56_v22 = vld [vmem:[%s1225_s2 + $0x40] sm:$0xff]  ;;  %v59_v23 = vld [vmem:[%s1225_s2 + $0x58] sm:$0xff]  ;;  %v957_v25 = vld [vmem:[%s1227_s0 + $0x28] sm:$0xff]  }
   0x9   :  { %v958_v26 = vld [vmem:[%s1227_s0 + $0x68] sm:$0xff]   ;;  %v959_v27 = vld [vmem:[%s1227_s0 + $0x30] sm:$0xff]   ;;  %v60_v30 = vld [vmem:[%s1225_s2 + $0x60] sm:$0xff] }
   0xa   :  { %107 = vperm.xlu1 %946, %v53_v11   ;;  %102 = vperm.xlu0 %945, %v52_v12   ;;  %v960_v28 = vld [vmem:[%s1227_s0 + $0x70] sm:$0xff]   ;;  %v61_v29 = vld [vmem:[%s1225_s2 + $0x68] sm:$0xff]  ;;  %v63_v31 = vld [vmem:[%s1225_s2 + $0x78] sm:$0xff] }
   0xb   :  { %v62_v32 = vld [vmem:[%s1225_s2 + $0x70] sm:$0xff]  ;;  %v961_v33 = vld [vmem:[%s1227_s0 + $0x38] sm:$0xff]   ;;  %v65_v35 = vld [vmem:[%s1225_s2 + $0x88] sm:$0xff] }
   0xc   :  { %v962_v34 = vld [vmem:[%s1227_s0 + $0x78] sm:$0xff]   ;;  %v64_v36 = vld [vmem:[%s1225_s2 + $0x80] sm:$0xff]  ;;  %v66_v38 = vld [vmem:[%s1225_s2 + $0x90] sm:$0xff] }
   0xd   :  { %v67_v37 = vld [vmem:[%s1225_s2 + $0x98] sm:$0xff]  ;;  %v69_v39 = vld [vmem:[%s1225_s2 + $0xa8] sm:$0xff]  ;;  %v68_v40 = vld [vmem:[%s1225_s2 + $0xa0] sm:$0xff] }
   0xe   :  { %117 = vperm.xlu1 %946, %v55_v15   ;;  %112 = vperm.xlu0 %945, %v54_v16   ;;  %v71_v41 = vld [vmem:[%s1225_s2 + $0xb8] sm:$0xff]  ;;  %v70_v42 = vld [vmem:[%s1225_s2 + $0xb0] sm:$0xff]  ;;  %v73_v43 = vld [vmem:[%s1225_s2 + $0xc8] sm:$0xff] }
   0xf   :  { %913 = vmatmul.mubr.msk.bf16.gmra.mrb[4].mxu0 %vm320_vm1, %v953_v17  ;;  %929 = vmatmul.mubr.msk.bf16.gmra.mrb[4].mxu1 %vm320_vm1, %v954_v18  ;;  %v72_v44 = vld [vmem:[%s1225_s2 + $0xc0] sm:$0xff]  ;;  %v75_v45 = vld [vmem:[%s1225_s2 + $0xd8] sm:$0xff]  ;;  %v74_v46 = vld [vmem:[%s1225_s2 + $0xd0] sm:$0xff] }
  0x10   :  { %916 = vmatprep.mubr.msk.bf16.mxu0 %vm320_vm1, %v955_v19  ;;  %932 = vmatprep.mubr.msk.bf16.mxu1 %vm320_vm1, %v956_v21  ;;  %v77_v47 = vld [vmem:[%s1225_s2 + $0xe8] sm:$0xff]  ;;  %v76_v48 = vld [vmem:[%s1225_s2 + $0xe0] sm:$0xff]  ;;  %v79_v49 = vld [vmem:[%s1225_s2 + $0xf8] sm:$0xff] }
  0x11   :  { %v78_v50 = vld [vmem:[%s1225_s2 + $0xf0] sm:$0xff] }
  0x12   :  { %127 = vperm.xlu1 %946, %v57_v20   ;;  %122 = vperm.xlu0 %945, %v56_v22  }
  0x16   :  { %137 = vperm.xlu1 %946, %v59_v23   ;;  %132 = vperm.xlu0 %945, %v58_v24  }
  0x17   :  { %917 = vmatmul.mubr.msk.bf16.gmra.mrb[8].mxu0 %vm320_vm1, %v957_v25  ;;  %933 = vmatmul.mubr.msk.bf16.gmra.mrb[8].mxu1 %vm320_vm1, %v958_v26 }
  0x18   :  { %920 = vmatprep.mubr.msk.bf16.mxu0 %vm320_vm1, %v959_v27  ;;  %936 = vmatprep.mubr.msk.bf16.mxu1 %vm320_vm1, %v960_v28 }
  0x1a   :  { %147 = vperm.xlu1 %946, %v61_v29   ;;  %142 = vperm.xlu0 %945, %v60_v30  }
  0x1e   :  { %157 = vperm.xlu1 %946, %v63_v31   ;;  %152 = vperm.xlu0 %945, %v62_v32  }
  0x1f   :  { %921 = vmatmul.mubr.msk.bf16.gmra.mrb[12].mxu0 %vm320_vm1, %v961_v33  ;;  %937 = vmatmul.mubr.msk.bf16.gmra.mrb[12].mxu1 %vm320_vm1, %v962_v34 }
  0x22   :  { %167 = vperm.xlu1 %946, %v65_v35   ;;  %162 = vperm.xlu0 %945, %v64_v36  }
  0x26   :  { %177 = vperm.xlu1 %946, %v67_v37   ;;  %172 = vperm.xlu0 %945, %v66_v38  }
  0x2a   :  { %187 = vperm.xlu1 %946, %v69_v39   ;;  %182 = vperm.xlu0 %945, %v68_v40  }
  0x2e   :  { %197 = vperm.xlu1 %946, %v71_v41   ;;  %192 = vperm.xlu0 %945, %v70_v42  }
  0x32   :  { %207 = vperm.xlu1 %946, %v73_v43   ;;  %202 = vperm.xlu0 %945, %v72_v44  }
  0x36   :  { %217 = vperm.xlu1 %946, %v75_v45   ;;  %212 = vperm.xlu0 %945, %v74_v46  }
  0x3a   :  { %227 = vperm.xlu1 %946, %v77_v47   ;;  %222 = vperm.xlu0 %945, %v76_v48  }
  0x3e   :  { %237 = vperm.xlu1 %946, %v79_v49   ;;  %232 = vperm.xlu0 %945, %v78_v50  }
  0x81   :  { %v93_v51 = vpop.permute.xlu1 %92  ;;  %v83_v52 = vpop.permute.xlu0 %82 }
  0x85   :  { %v98_v53 = vpop.permute.xlu1 %97  ;;  %v88_v54 = vpop.permute.xlu0 %87 }
  0x89   :  { %v108_v55 = vpop.permute.xlu1 %107  ;;  %v103_v56 = vpop.permute.xlu0 %102 }
  0x8d   :  { %v118_v57 = vpop.permute.xlu1 %117  ;;  %v113_v58 = vpop.permute.xlu0 %112 }
  0x91   :  { %v1147_v59 = vpop.permute.xlu1 %127  ;;  %v1149_v60 = vpop.permute.xlu0 %122 }
  0x95   :  { %v1151_v61 = vpop.permute.xlu1 %137  ;;  %v1153_v62 = vpop.permute.xlu0 %132 }
  0x99   :  { %v1155_v63 = vpop.permute.xlu1 %147  ;;  %v1157_v0 = vpop.permute.xlu0 %142 }
  0x9d   :  { %v1159_v1 = vpop.permute.xlu1 %157  ;;  %v1161_v2 = vpop.permute.xlu0 %152 }
  0xa1   :  { %v168_v3 = vpop.permute.xlu1 %167  ;;  %v163_v4 = vpop.permute.xlu0 %162 }
  0xa5   :  { %v178_v5 = vpop.permute.xlu1 %177  ;;  %v173_v6 = vpop.permute.xlu0 %172 }
  0xa9   :  { %v188_v7 = vpop.permute.xlu1 %187  ;;  %v183_v8 = vpop.permute.xlu0 %182 }
  0xad   :  { %v198_v9 = vpop.permute.xlu1 %197  ;;  %v193_v10 = vpop.permute.xlu0 %192 }
  0xb1   :  { %v1163_v11 = vpop.permute.xlu1 %207  ;;  %v1165_v12 = vpop.permute.xlu0 %202 }
  0xb5   :  { %v218_v32 = vpop.permute.xlu1 %217  ;;  %v213_v34 = vpop.permute.xlu0 %212 }
  0xda   :  { %v910_v13 = vpop.f32.mrb[0].mxu0  ;;  %v926_v14 = vpop.f32.mrb[0].mxu1 }
  0xdb   :  { %v407_v15 = vpop.f32.mrb[1].mxu0  ;;  %v471_v16 = vpop.f32.mrb[1].mxu1  ;;  %v416_v18 = vadd.f32 %v910_v13, %v93_v51  ;;  %v480_v22 = vadd.f32 %v926_v14, %v173_v6 }
  0xdc   :  { %v911_v17 = vpop.f32.mrb[2].mxu0  ;;  %v927_v20 = vpop.f32.mrb[2].mxu1  ;;  %v408_v23 = vadd.f32 %v407_v15, %v83_v52  ;;  %v472_v27 = vadd.f32 %v471_v16, %v163_v4 }
  0xdd   :  { %v419_v19 = vadd.f32 %v911_v17, %v98_v53  ;;  %v410_v21 = vpop.f32.mrb[3].mxu0  ;;  %v483_v24 = vadd.f32 %v927_v20, %v178_v5  ;;  %v474_v26 = vpop.f32.mrb[3].mxu1 }
  0xde   :  { %v411_v25 = vadd.f32 %v410_v21, %v88_v54  ;;  %v475_v29 = vadd.f32 %v474_v26, %v168_v3  ;;  %v228_v54 = vpop.permute.xlu1 %227 }
  0xdf   :  { %v802_v28 = vpack.c.bf16 %v419_v19, %v416_v18  ;;  %v842_v30 = vpack.c.bf16 %v483_v24, %v480_v22 }
  0xe0   :  { %v797_v31 = vpack.c.bf16 %v411_v25, %v408_v23  ;;  %v837_v33 = vpack.c.bf16 %v475_v29, %v472_v27 }
  0xe1   :  { %874 = vst [vmem:[%s1228_s3 + $0x8] sm:$0xff] %v802_v28   ;;  %882 = vst [vmem:[%s1228_s3 + $0x48] sm:$0xff] %v842_v30  }
  0xe2   :  { %798 = vst [vmem:[%s1228_s3] sm:$0xff] %v797_v31   ;;  %v914_v35 = vpop.f32.mrb[4].mxu0  ;;  %881 = vst [vmem:[%s1228_s3 + $0x40] sm:$0xff] %v837_v33   ;;  %v930_v36 = vpop.f32.mrb[4].mxu1 }
  0xe3   :  { %v423_v37 = vpop.f32.mrb[5].mxu0  ;;  %v487_v38 = vpop.f32.mrb[5].mxu1  ;;  %v432_v40 = vadd.f32 %v914_v35, %v113_v58  ;;  %v496_v44 = vadd.f32 %v930_v36, %v193_v10 }
  0xe4   :  { %v915_v39 = vpop.f32.mrb[6].mxu0  ;;  %v931_v42 = vpop.f32.mrb[6].mxu1  ;;  %v424_v45 = vadd.f32 %v423_v37, %v103_v56  ;;  %v488_v49 = vadd.f32 %v487_v38, %v183_v8 }
  0xe5   :  { %v435_v41 = vadd.f32 %v915_v39, %v118_v57  ;;  %v426_v43 = vpop.f32.mrb[7].mxu0  ;;  %v499_v46 = vadd.f32 %v931_v42, %v198_v9  ;;  %v490_v48 = vpop.f32.mrb[7].mxu1 }
  0xe6   :  { %v427_v47 = vadd.f32 %v426_v43, %v108_v55  ;;  %v491_v51 = vadd.f32 %v490_v48, %v188_v7  ;;  %v223_v58 = vpop.permute.xlu0 %222  ;;  %v238_v22 = vpop.permute.xlu1 %237 }
  0xe7   :  { %v812_v50 = vpack.c.bf16 %v435_v41, %v432_v40  ;;  %v852_v52 = vpack.c.bf16 %v499_v46, %v496_v44 }
  0xe8   :  { %v807_v53 = vpack.c.bf16 %v427_v47, %v424_v45  ;;  %v847_v3 = vpack.c.bf16 %v491_v51, %v488_v49 }
  0xe9   :  { %876 = vst [vmem:[%s1228_s3 + $0x18] sm:$0xff] %v812_v50   ;;  %884 = vst [vmem:[%s1228_s3 + $0x58] sm:$0xff] %v852_v52  }
  0xea   :  { %875 = vst [vmem:[%s1228_s3 + $0x10] sm:$0xff] %v807_v53   ;;  %v918_v55 = vpop.f32.mrb[8].mxu0  ;;  %883 = vst [vmem:[%s1228_s3 + $0x50] sm:$0xff] %v847_v3   ;;  %v934_v56 = vpop.f32.mrb[8].mxu1 }
  0xeb   :  { %v439_v57 = vpop.f32.mrb[9].mxu0  ;;  %v503_v4 = vpop.f32.mrb[9].mxu1  ;;  %v448_v6 = vadd.f32 %v918_v55, %v1153_v62  ;;  %v512_v10 = vadd.f32 %v934_v56, %v213_v34 }
  0xec   :  { %v919_v5 = vpop.f32.mrb[10].mxu0  ;;  %v935_v8 = vpop.f32.mrb[10].mxu1  ;;  %v440_v13 = vadd.f32 %v439_v57, %v1149_v60  ;;  %v504_v17 = vadd.f32 %v503_v4, %v1165_v12 }
  0xed   :  { %v451_v7 = vadd.f32 %v919_v5, %v1151_v61  ;;  %v442_v9 = vpop.f32.mrb[11].mxu0  ;;  %v515_v14 = vadd.f32 %v935_v8, %v218_v32  ;;  %v506_v16 = vpop.f32.mrb[11].mxu1 }
  0xee   :  { %v443_v15 = vadd.f32 %v442_v9, %v1147_v59  ;;  %v507_v19 = vadd.f32 %v506_v16, %v1163_v11  ;;  %v233_v62 = vpop.permute.xlu0 %232 }
  0xef   :  { %v822_v18 = vpack.c.bf16 %v451_v7, %v448_v6  ;;  %v862_v20 = vpack.c.bf16 %v515_v14, %v512_v10 }
  0xf0   :  { %v817_v21 = vpack.c.bf16 %v443_v15, %v440_v13  ;;  %v857_v61 = vpack.c.bf16 %v507_v19, %v504_v17 }
  0xf1   :  { %878 = vst [vmem:[%s1228_s3 + $0x28] sm:$0xff] %v822_v18   ;;  %886 = vst [vmem:[%s1228_s3 + $0x68] sm:$0xff] %v862_v20  }
  0xf2   :  { %877 = vst [vmem:[%s1228_s3 + $0x20] sm:$0xff] %v817_v21   ;;  %v922_v59 = vpop.f32.mrb[12].mxu0  ;;  %885 = vst [vmem:[%s1228_s3 + $0x60] sm:$0xff] %v857_v61   ;;  %v938_v60 = vpop.f32.mrb[12].mxu1 }
  0xf3   :  { %v455_v11 = vpop.f32.mrb[13].mxu0  ;;  %v519_v12 = vpop.f32.mrb[13].mxu1  ;;  %v464_v24 = vadd.f32 %v922_v59, %v1161_v2  ;;  %v528_v28 = vadd.f32 %v938_v60, %v233_v62 }
  0xf4   :  { %v923_v23 = vpop.f32.mrb[14].mxu0  ;;  %v939_v26 = vpop.f32.mrb[14].mxu1  ;;  %v456_v29 = vadd.f32 %v455_v11, %v1157_v0  ;;  %v520_v33 = vadd.f32 %v519_v12, %v223_v58 }
  0xf5   :  { %v467_v25 = vadd.f32 %v923_v23, %v1159_v1  ;;  %v458_v27 = vpop.f32.mrb[15].mxu0  ;;  %v531_v30 = vadd.f32 %v939_v26, %v238_v22  ;;  %v522_v32 = vpop.f32.mrb[15].mxu1 }
  0xf6   :  { %v459_v31 = vadd.f32 %v458_v27, %v1155_v63  ;;  %v523_v35 = vadd.f32 %v522_v32, %v228_v54 }
  0xf7   :  { %v832_v34 = vpack.c.bf16 %v467_v25, %v464_v24  ;;  %v872_v36 = vpack.c.bf16 %v531_v30, %v528_v28 }
  0xf8   :  { %v827_v37 = vpack.c.bf16 %v459_v31, %v456_v29  ;;  %v867_v2 = vpack.c.bf16 %v523_v35, %v520_v33 }
  0xf9   :  { %880 = vst [vmem:[%s1228_s3 + $0x38] sm:$0xff] %v832_v34   ;;  %888 = vst [vmem:[%s1228_s3 + $0x78] sm:$0xff] %v872_v36  }
  0xfa   :  { %879 = vst [vmem:[%s1228_s3 + $0x30] sm:$0xff] %v827_v37   ;;  %887 = vst [vmem:[%s1228_s3 + $0x70] sm:$0xff] %v867_v2  }

// kernel: vae_forward.15
= control target key start
LH: loop header
LB: loop body
LE: loop exit
PB: predicated region body
PF: predicated region fallthrough
CT: control target
= control target key end

     0   :  { %v180_v0 = vmov 0.0   ;;  %vm181_vm0 = vmmov 0   ;;  %v182_v2 = vmov 0   ;;  %s236_s1 = inlined_call_operand.vmem [shape: bf16[128,128], index: 1, kind: input, shape index: {}]   ;;  %s237_s2 = inlined_call_operand.vmem [shape: f32[5,1], index: 2, kind: input, shape index: {}]   ;;  %s238_s0 = inlined_call_operand.vmem [shape: bf16[5,128], index: 0, kind: input, shape index: {}]   ;;  %s239_s3 = inlined_call_operand.vmem [shape: f32[5,128], index: 3, kind: output, shape index: {}]  }
   0x1   :  { %148 = vmatprep.subr.bf16.mxu0 %v180_v0  ;;  %v172_v1 = vld [vmem:[%s236_s1] sm:$0xff]   ;;  %164 = vmatprep.mubr.msk.bf16.mxu0 %vm181_vm0, %v180_v0  ;;  %v173_v3 = vld [vmem:[%s236_s1 + $0x8] sm:$0xff]   ;;  %v174_v4 = vld [vmem:[%s236_s1 + $0x10] sm:$0xff]  }
   0x2   :  { %171 = vset.pattern.permute.xlu0 %v182_v2  ;;  %149 = vmatpush3.bf16.msra.mxu0 %v172_v1  ;;  %v32_v5 = vld [vmem:[%s237_s2] sm:$0x1f]  ;;  %v175_v6 = vld [vmem:[%s236_s1 + $0x18] sm:$0xff]   ;;  %v177_v8 = vld [vmem:[%s236_s1 + $0x28] sm:$0xff]  }
   0x3   :  { %150 = vmatprep.subr.bf16.mxu0 %v180_v0  ;;  %35 = vperm.xlu0 %171, %v32_v5   ;;  %v176_v7 = vld [vmem:[%s236_s1 + $0x20] sm:$0xff]   ;;  %v178_v9 = vld [vmem:[%s236_s1 + $0x30] sm:$0xff]   ;;  %v179_v10 = vld [vmem:[%s236_s1 + $0x38] sm:$0xff]  }
   0x4   :  { %v15_v11 = vld [vmem:[%s238_s0] sm:$0x7] }
   0x6   :  { %151 = vmatpush3.bf16.msra.mxu0 %v173_v3 }
   0x7   :  { %152 = vmatprep.subr.bf16.mxu0 %v180_v0 }
   0xa   :  { %153 = vmatpush3.bf16.msra.mxu0 %v174_v4 }
   0xb   :  { %154 = vmatprep.subr.bf16.mxu0 %v180_v0 }
   0xe   :  { %155 = vmatpush3.bf16.msra.mxu0 %v175_v6 }
   0xf   :  { %156 = vmatprep.subr.bf16.mxu0 %v180_v0 }
  0x12   :  { %157 = vmatpush3.bf16.msra.mxu0 %v176_v7 }
  0x13   :  { %158 = vmatprep.subr.bf16.mxu0 %v180_v0 }
  0x16   :  { %159 = vmatpush3.bf16.msra.mxu0 %v177_v8 }
  0x17   :  { %160 = vmatprep.subr.bf16.mxu0 %v180_v0 }
  0x1a   :  { %161 = vmatpush3.bf16.msra.mxu0 %v178_v9 }
  0x1b   :  { %162 = vmatprep.subr.bf16.mxu0 %v180_v0 }
  0x1e   :  { %163 = vmatpush3.bf16.msra.mxu0 %v179_v10 }
  0x21   :  { %165 = vmatmul.mubr.bf16.vlgmr.msra.gmra.mrb[0].mxu0 %v15_v11 }
  0x82   :  { %v36_v12 = vpop.permute.xlu0 %35 }
  0xf4   :  { %v120_v13 = vpop.f32.mrb[0].mxu0 }
  0xf5   :  { %v121_v14 = vadd.f32 %v120_v13, %v36_v12  ;;  %v166_v15 = vpop.f32.mrb[1].mxu0 }
  0xf6   :  { %v123_v16 = vpop.f32.mrb[2].mxu0 }
  0xf7   :  { %126 = vst [vmem:[%s239_s3] sm:$0x1f] %v121_v14  ;;  %v167_v17 = vpop.f32.mrb[3].mxu0 }

// kernel: vae_forward.17
= control target key start
LH: loop header
LB: loop body
LE: loop exit
PB: predicated region body
PF: predicated region fallthrough
CT: control target
= control target key end

     0   :  { %v287_v0 = vmov 0   ;;  %vm133_vm0 = vcmask 130048   ;;  %s365_s1 = inlined_call_operand.vmem [shape: bf16[144,128], index: 1, kind: input, shape index: {}]   ;;  %s366_s0 = inlined_call_operand.vmem [shape: bf16[32,144], index: 0, kind: input, shape index: {}]   ;;  %s367_s2 = inlined_call_operand.vmem [shape: f32[32,1], index: 2, kind: input, shape index: {}]   ;;  %s368_s3 = inlined_call_operand.vmem [shape: bf16[32,128], index: 3, kind: output, shape index: {}]  }
   0x1   :  { %140 = vmatprep.subr.bf16.mxu0 %v287_v0  ;;  %251 = vmatprep.subr.bf16.mxu1 %v287_v0  ;;  %v272_v1 = vld [vmem:[%s365_s1] sm:$0xff]   ;;  %v273_v2 = vld [vmem:[%s365_s1 + $0x8] sm:$0xff]   ;;  %v274_v3 = vld [vmem:[%s365_s1 + $0x10] sm:$0xff]  }
   0x2   :  { %271 = vset.pattern.permute.xlu1 %v287_v0  ;;  %270 = vset.pattern.permute.xlu0 %v287_v0  ;;  %v275_v4 = vld [vmem:[%s365_s1 + $0x18] sm:$0xff]   ;;  %v283_v5 = vld [vmem:[%s366_s0 + $0x4] ss:$8 sps:$4 sm:$0xff]   ;;  %v39_v7 = vld [vmem:[%s367_s2 + $0x10] sm:$0xff] }
   0x3   :  { %141 = vmatpush1.bf16.msra.mxu0 %v272_v1  ;;  %260 = vmatpush1.bf16.msra.mxu1 %v272_v1  ;;  %v286_v6 = vld [vmem:[%s366_s0 + $0x14] ss:$8 sps:$4 sm:$0xff]   ;;  %v37_v8 = vld [vmem:[%s367_s2] sm:$0xff]  ;;  %v38_v11 = vld [vmem:[%s367_s2 + $0x8] sm:$0xff] }
   0x4   :  { %142 = vmatprep.subr.bf16.mxu0 %v287_v0  ;;  %252 = vmatprep.subr.bf16.mxu1 %v287_v0  ;;  %v40_v9 = vld [vmem:[%s367_s2 + $0x18] sm:$0xff]  ;;  %v276_v10 = vld [vmem:[%s365_s1 + $0x20] sm:$0xff]   ;;  %v277_v12 = vld [vmem:[%s365_s1 + $0x28] sm:$0xff]  }
   0x5   :  { %230 = vmatprep.mubr.msk.bf16.mxu0 %vm133_vm0, %v283_v5  ;;  %53 = vperm.xlu1 %271, %v39_v7   ;;  %v278_v13 = vld [vmem:[%s365_s1 + $0x30] sm:$0xff]   ;;  %v279_v14 = vld [vmem:[%s365_s1 + $0x38] sm:$0xff]   ;;  %v280_v15 = vld [vmem:[%s365_s1 + $0x40] sm:$0xff]  }
   0x6   :  { %231 = vmatprep.mubr.msk.bf16.mxu1 %vm133_vm0, %v286_v6  ;;  %43 = vperm.xlu0 %270, %v37_v8   ;;  %v281_v16 = vld [vmem:[%s366_s0] ss:$8 sps:$4 sm:$0xff]   ;;  %v284_v17 = vld [vmem:[%s366_s0 + $0x10] ss:$8 sps:$4 sm:$0xff]  }
   0x7   :  { %143 = vmatpush1.bf16.msra.mxu0 %v273_v2  ;;  %261 = vmatpush1.bf16.msra.mxu1 %v273_v2 }
   0x8   :  { %144 = vmatprep.subr.bf16.mxu0 %v287_v0  ;;  %253 = vmatprep.subr.bf16.mxu1 %v287_v0 }
   0x9   :  { %58 = vperm.xlu1 %271, %v40_v9  }
   0xa   :  { %48 = vperm.xlu0 %270, %v38_v11  }
   0xb   :  { %145 = vmatpush1.bf16.msra.mxu0 %v274_v3  ;;  %262 = vmatpush1.bf16.msra.mxu1 %v274_v3 }
   0xc   :  { %146 = vmatprep.subr.bf16.mxu0 %v287_v0  ;;  %254 = vmatprep.subr.bf16.mxu1 %v287_v0 }
   0xf   :  { %147 = vmatpush1.bf16.msra.mxu0 %v275_v4  ;;  %263 = vmatpush1.bf16.msra.mxu1 %v275_v4 }
  0x10   :  { %148 = vmatprep.subr.bf16.mxu0 %v287_v0  ;;  %255 = vmatprep.subr.bf16.mxu1 %v287_v0 }
  0x13   :  { %149 = vmatpush1.bf16.msra.mxu0 %v276_v10  ;;  %264 = vmatpush1.bf16.msra.mxu1 %v276_v10 }
  0x14   :  { %150 = vmatprep.subr.bf16.mxu0 %v287_v0  ;;  %256 = vmatprep.subr.bf16.mxu1 %v287_v0 }
  0x17   :  { %151 = vmatpush1.bf16.msra.mxu0 %v277_v12  ;;  %265 = vmatpush1.bf16.msra.mxu1 %v277_v12 }
  0x18   :  { %152 = vmatprep.subr.bf16.mxu0 %v287_v0  ;;  %257 = vmatprep.subr.bf16.mxu1 %v287_v0 }
  0x1b   :  { %153 = vmatpush1.bf16.msra.mxu0 %v278_v13  ;;  %266 = vmatpush1.bf16.msra.mxu1 %v278_v13 }
  0x1c   :  { %154 = vmatprep.subr.bf16.mxu0 %v287_v0  ;;  %258 = vmatprep.subr.bf16.mxu1 %v287_v0 }
  0x1f   :  { %155 = vmatpush1.bf16.msra.mxu0 %v279_v14  ;;  %267 = vmatpush1.bf16.msra.mxu1 %v279_v14 }
  0x20   :  { %156 = vmatprep.subr.bf16.mxu0 %v287_v0  ;;  %259 = vmatprep.subr.bf16.mxu1 %v287_v0 }
  0x23   :  { %157 = vmatpush1.bf16.msra.mxu0 %v280_v15  ;;  %268 = vmatpush1.bf16.msra.mxu1 %v280_v15 }
  0x26   :  { %173 = vmatmul.mubr.bf16.vlgmr.msra.gmra.mrb[0].mxu0 %v281_v16  ;;  %181 = vmatmul.mubr.bf16.vlgmr.msra.gmra.mrb[0].mxu1 %v284_v17 }
  0x84   :  { %v54_v18 = vpop.permute.xlu1 %53 }
  0x85   :  { %v44_v19 = vpop.permute.xlu0 %43 }
  0x88   :  { %v59_v20 = vpop.permute.xlu1 %58 }
  0x89   :  { %v49_v21 = vpop.permute.xlu0 %48 }
  0xf9   :  { %v174_v22 = vpop.f32.mrb[0].mxu0  ;;  %v182_v23 = vpop.f32.mrb[0].mxu1 }
  0xfa   :  { %v175_v24 = vadd.f32 %v174_v22, %v44_v19  ;;  %v183_v25 = vadd.f32 %v182_v23, %v54_v18  ;;  %v176_v26 = vpop.f32.mrb[1].mxu0  ;;  %v184_v27 = vpop.f32.mrb[1].mxu1 }
  0xfb   :  { %v177_v28 = vpop.f32.mrb[2].mxu0  ;;  %v185_v29 = vpop.f32.mrb[2].mxu1 }
  0xfc   :  { %v178_v30 = vadd.f32 %v177_v28, %v49_v21  ;;  %v186_v31 = vadd.f32 %v185_v29, %v59_v20  ;;  %v179_v32 = vpop.f32.mrb[3].mxu0  ;;  %v187_v33 = vpop.f32.mrb[3].mxu1  ;;  %v189_v34 = vmax.f32 %v175_v24, 0.0  ;;  %v191_v35 = vmax.f32 %v183_v25, 0.0 }
  0xfe   :  { %v190_v36 = vmax.f32 %v178_v30, 0.0  ;;  %v192_v37 = vmax.f32 %v186_v31, 0.0 }
 0x100   :  { %v243_v38 = vpack.c.bf16 %v190_v36, %v189_v34  ;;  %v248_v39 = vpack.c.bf16 %v192_v37, %v191_v35 }
 0x102   :  { %244 = vst [vmem:[%s368_s3] sm:$0xff] %v243_v38   ;;  %250 = vst [vmem:[%s368_s3 + $0x8] sm:$0xff] %v248_v39  }

// kernel: vae_forward.18
= control target key start
LH: loop header
LB: loop body
LE: loop exit
PB: predicated region body
PF: predicated region fallthrough
CT: control target
= control target key end

     0   :  { %v181_v0 = vmov 0.0   ;;  %vm182_vm0 = vmmov 0   ;;  %v183_v2 = vmov 0   ;;  %vm74_vm1 = vcmask 1043456   ;;  %s231_s1 = inlined_call_operand.vmem [shape: bf16[72,128], index: 1, kind: input, shape index: {}]   ;;  %s232_s2 = inlined_call_operand.vmem [shape: f32[16,1], index: 2, kind: input, shape index: {}]   ;;  %s233_s0 = inlined_call_operand.vmem [shape: bf16[16,72], index: 0, kind: input, shape index: {}]   ;;  %s234_s3 = inlined_call_operand.vmem [shape: bf16[16,128], index: 3, kind: output, shape index: {}]  }
   0x1   :  { %157 = vmatprep.subr.bf16.mxu0 %v181_v0  ;;  %v175_v1 = vld [vmem:[%s231_s1] sm:$0xff]   ;;  %167 = vmatprep.mubr.msk.bf16.mxu0 %vm182_vm0, %v181_v0  ;;  %v176_v3 = vld [vmem:[%s231_s1 + $0x8] sm:$0xff]   ;;  %v177_v5 = vld [vmem:[%s231_s1 + $0x10] sm:$0xff]   ;;  %vm70_vm2 = vcmask 588800  }
   0x2   :  { %174 = vset.pattern.permute.xlu0 %v183_v2  ;;  %158 = vmatpush3.bf16.msra.mxu0 %v175_v1  ;;  %v26_v4 = vld [vmem:[%s232_s2] sm:$0xff]  ;;  %v27_v6 = vld [vmem:[%s232_s2 + $0x8] sm:$0xff]  ;;  %v178_v7 = vld [vmem:[%s231_s1 + $0x18] sm:$0xff]  }
   0x3   :  { %159 = vmatprep.subr.bf16.mxu0 %v181_v0  ;;  %30 = vperm.xlu0 %174, %v26_v4   ;;  %v179_v8 = vld [vmem:[%s231_s1 + $0x20] ss:$0 sps:$4 sm:$0xff]  }
   0x4   :  { %v76_v9 = vsel %vm74_vm1, %v179_v8, 0  ;;  %v180_v10 = vld [vmem:[%s233_s0] sm:$0xff]  }
   0x6   :  { %160 = vmatpush3.bf16.msra.mxu0 %v176_v3 }
   0x7   :  { %161 = vmatprep.subr.bf16.mxu0 %v181_v0  ;;  %35 = vperm.xlu0 %174, %v27_v6  }
   0xa   :  { %162 = vmatpush3.bf16.msra.mxu0 %v177_v5 }
   0xb   :  { %163 = vmatprep.subr.bf16.mxu0 %v181_v0 }
   0xe   :  { %164 = vmatpush3.bf16.msra.mxu0 %v178_v7 }
   0xf   :  { %165 = vmatprep.subr.bf16.mxu0 %v181_v0 }
  0x12   :  { %166 = vmatpush3.bf16.msra.mxu0 %v76_v9 }
  0x15   :  { %168 = vmatmul.mubr.msk.bf16.vlgmr.msra.gmra.mrb[0].mxu0 %vm70_vm2, %v180_v10 }
  0x82   :  { %v31_v11 = vpop.permute.xlu0 %30 }
  0x86   :  { %v36_v15 = vpop.permute.xlu0 %35 }
  0xe8   :  { %v112_v12 = vpop.f32.mrb[0].mxu0 }
  0xe9   :  { %v113_v13 = vadd.f32 %v112_v12, %v31_v11  ;;  %v169_v14 = vpop.f32.mrb[1].mxu0 }
  0xea   :  { %v115_v16 = vpop.f32.mrb[2].mxu0 }
  0xeb   :  { %v116_v17 = vadd.f32 %v115_v16, %v36_v15  ;;  %v170_v18 = vpop.f32.mrb[3].mxu0  ;;  %v119_v19 = vmax.f32 %v113_v13, 0.0 }
  0xed   :  { %v120_v20 = vmax.f32 %v116_v17, 0.0 }
  0xef   :  { %v149_v21 = vpack.c.bf16 %v120_v20, %v119_v19 }
  0xf1   :  { %150 = vst [vmem:[%s234_s3] sm:$0xff] %v149_v21  }

// kernel: vae_forward.19
= control target key start
LH: loop header
LB: loop body
LE: loop exit
PB: predicated region body
PF: predicated region fallthrough
CT: control target
= control target key end

     0   :  { %v273_v1 = vmov 0   ;;  %vm86_vm0 = vcmask 1041408   ;;  %vm82_vm1 = vcmask 293888   ;;  %s340_s1 = inlined_call_operand.vmem [shape: bf16[36,512], index: 1, kind: input, shape index: {}]   ;;  %s341_s2 = inlined_call_operand.vmem [shape: f32[4,1], index: 2, kind: input, shape index: {}]   ;;  %s342_s0 = inlined_call_operand.vmem [shape: bf16[4,36], index: 0, kind: input, shape index: {}]   ;;  %s343_s3 = inlined_call_operand.vmem [shape: f32[4,512], index: 3, kind: output, shape index: {}]  }
   0x1   :  { %v241_v0 = vld [vmem:[%s340_s1 + $0x4] ss:$16 sps:$4 sm:$0xff]   ;;  %131 = vmatprep.mubr.bf16.mxu0 %v273_v1  ;;  %172 = vmatprep.mubr.bf16.mxu1 %v273_v1  ;;  %v243_v2 = vld [vmem:[%s340_s1 + $0xc] ss:$16 sps:$4 sm:$0xff]   ;;  %v245_v3 = vld [vmem:[%s340_s1] ss:$16 sps:$4 sm:$0xff]  }
   0x2   :  { %240 = vset.pattern.permute.xlu0 %v273_v1  ;;  %99 = vmatprep.subr.bf16.mxu0 %v241_v0  ;;  %v246_v4 = vld [vmem:[%s340_s1 + $0x8] ss:$16 sps:$4 sm:$0xff]   ;;  %v247_v5 = vld [vmem:[%s340_s1 + $0x24] ss:$16 sps:$4 sm:$0xff]   ;;  %v249_v6 = vld [vmem:[%s340_s1 + $0x2c] ss:$16 sps:$4 sm:$0xff]  }
   0x3   :  { %140 = vmatprep.subr.bf16.mxu1 %v243_v2  ;;  %100 = vmatpush1.bf16.msra.mxu0 %v245_v3  ;;  %v251_v7 = vld [vmem:[%s340_s1 + $0x20] ss:$16 sps:$4 sm:$0xff]   ;;  %v252_v8 = vld [vmem:[%s340_s1 + $0x28] ss:$16 sps:$4 sm:$0xff]  }
   0x4   :  { %141 = vmatpush1.bf16.msra.mxu1 %v246_v4  ;;  %101 = vmatprep.subr.bf16.mxu0 %v247_v5  ;;  %v24_v9 = vld [vmem:[%s340_s1 + $0x40] sm:$0x33]  ;;  %v25_v10 = vld [vmem:[%s340_s1 + $0x48] sm:$0x33] }
   0x5   :  { %142 = vmatprep.subr.bf16.mxu1 %v249_v6  ;;  %v228_v11 = vcombine.high %v24_v9, %v24_v9  ;;  %v230_v12 = vcombine.high %v25_v10, %v25_v10  ;;  %v227_v13 = vcombine.low %v24_v9, %v24_v9  ;;  %v229_v14 = vcombine.low %v25_v10, %v25_v10  ;;  %v26_v15 = vld [vmem:[%s341_s2] sm:$0xf] }
   0x6   :  { %29 = vperm.xlu0 %240, %v26_v15   ;;  %v15_v18 = vld [vmem:[%s342_s0] sm:$0x3] }
   0x7   :  { %102 = vmatpush1.bf16.msra.mxu0 %v251_v7  ;;  %v88_v16 = vsel %vm86_vm0, %v227_v13, 0  ;;  %v94_v17 = vsel %vm86_vm0, %v229_v14, 0 }
   0x8   :  { %143 = vmatpush1.bf16.msra.mxu1 %v252_v8  ;;  %231 = vmatprep.subr.msk.bf16.mxu0 %vm86_vm0, %v228_v11 }
   0x9   :  { %233 = vmatprep.subr.msk.bf16.mxu1 %vm86_vm0, %v230_v12 }
   0xb   :  { %104 = vmatpush1.bf16.msra.mxu0 %v88_v16 }
   0xc   :  { %145 = vmatpush1.bf16.msra.mxu1 %v94_v17 }
   0xe   :  { %232 = vmatmul.mubr.msk.bf16.vlgmr.msra.gmra.mrb[0].mxu0 %vm82_vm1, %v15_v18 }
   0xf   :  { %234 = vmatmul.mubr.msk.bf16.vlgmr.msra.gmra.mrb[0].mxu1 %vm82_vm1, %v15_v18 }
  0x85   :  { %v30_v19 = vpop.permute.xlu0 %29 }
  0xe1   :  { %v133_v20 = vpop.f32.mrb[0].mxu0 }
  0xe2   :  { %v174_v21 = vpop.f32.mrb[0].mxu1  ;;  %v134_v22 = vadd.f32 %v133_v20, %v30_v19  ;;  %v135_v24 = vpop.f32.mrb[1].mxu0 }
  0xe3   :  { %v175_v23 = vadd.f32 %v174_v21, %v30_v19  ;;  %v176_v25 = vpop.f32.mrb[1].mxu1  ;;  %v136_v26 = vadd.f32 %v135_v24, %v30_v19  ;;  %v137_v28 = vpop.f32.mrb[2].mxu0 }
  0xe4   :  { %v177_v27 = vadd.f32 %v176_v25, %v30_v19  ;;  %v178_v29 = vpop.f32.mrb[2].mxu1  ;;  %v235_v30 = vmul.f32 -1.442695, %v134_v22  ;;  %v138_v32 = vpop.f32.mrb[3].mxu0 }
  0xe5   :  { %v237_v31 = vmul.f32 -1.442695, %v175_v23  ;;  %v179_v33 = vpop.f32.mrb[3].mxu1  ;;  %v236_v34 = vmul.f32 -1.442695, %v136_v26 }
  0xe6   :  { %v238_v35 = vmul.f32 -1.442695, %v177_v27  ;;  %257 = vpow2.f32 %v235_v30 }
  0xe7   :  { %259 = vpow2.f32 %v237_v31 }
  0xe8   :  { %261 = vpow2.f32 %v236_v34 }
  0xe9   :  { %263 = vpow2.f32 %v238_v35 }
  0xf0   :  { %v258_v36 = vpop.eup %257 }
  0xf1   :  { %v260_v37 = vpop.eup %259  ;;  %v193_v38 = vadd.f32 1.0, %v258_v36 }
  0xf2   :  { %v262_v39 = vpop.eup %261  ;;  %v195_v40 = vadd.f32 1.0, %v260_v37 }
  0xf3   :  { %v264_v41 = vpop.eup %263  ;;  %265 = vrcp.f32 %v193_v38  ;;  %v194_v42 = vadd.f32 1.0, %v262_v39 }
  0xf4   :  { %267 = vrcp.f32 %v195_v40  ;;  %v196_v43 = vadd.f32 1.0, %v264_v41 }
  0xf5   :  { %269 = vrcp.f32 %v194_v42 }
  0xf6   :  { %271 = vrcp.f32 %v196_v43 }
  0xfd   :  { %v266_v44 = vpop.eup %265 }
  0xfe   :  { %v268_v45 = vpop.eup %267 }
  0xff   :  { %v270_v46 = vpop.eup %269 }
 0x100   :  { %v272_v47 = vpop.eup %271  ;;  %v209_v48 = vcombine.low %v266_v44, %v270_v46 }
 0x101   :  { %v210_v49 = vcombine.low %v268_v45, %v272_v47 }
 0x102   :  { %213 = vst [vmem:[%s343_s3] sm:$0xff] %v209_v48 }
 0x103   :  { %214 = vst [vmem:[%s343_s3 + $0x8] sm:$0xff] %v210_v49 }

</bundles_post_ra>
